<compile_context>
chip_gen: v7x
topology: tpu7x:2x2x1
jax: 0.10.0
libtpu: 0.0.40
codegen_flags: <defaults>
</compile_context>

<pallas_src>
import functools

import numpy as np
import jax
import jax.numpy as jnp
from jax.experimental import pallas as pl
from jax.experimental.pallas import tpu as pltpu

K = 7            # conv kernel size
PAD = K // 2     # "same" padding


def spatial_attn_kernel(b_ref, wmask_ref, x_ref, o_ref, *, H, W):
    """One batch element per grid step.

    b_ref    : SMEM (1,)           folded BN bias
    wmask_ref: VMEM (K*K, 2, H*W)  per-tap [w_mean/C, w_max] * boundary mask
    x_ref    : VMEM (1, C, H*W)    lane-dense input block
    o_ref    : VMEM (1, C, H*W)    lane-dense output block
    """
    HW = H * W
    x2d = x_ref[0]                                        # (C, HW), input dtype

    # Channel descriptors on the lane-dense block (block is DMA'd to VMEM once;
    # both reductions read the same resident block). Mean's 1/C is folded into
    # the tap weights, so only the sum is needed here (f32 accumulation).
    ch_sum = jnp.sum(x2d.astype(jnp.float32), axis=0, keepdims=True)   # (1, HW)
    ch_max = jnp.max(x2d, axis=0, keepdims=True).astype(jnp.float32)   # (1, HW)
    maps = jnp.concatenate([ch_sum, ch_max], axis=0)                   # (2, HW)

    # 7x7 "same" conv as 49 lane rotations of the flattened maps.  For a tap
    # offset (dy, dx) the shifted flat index is i + dy*W + dx; positions whose
    # source falls outside the image have weight 0 in wmask, which implements
    # the zero padding (wrap-around values are multiplied by 0).
    accs = [jnp.zeros((2, HW), jnp.float32) for _ in range(4)]
    for ky in range(K):
        for kx in range(K):
            t = ky * K + kx
            d = (ky - PAD) * W + (kx - PAD)
            if d == 0:
                rolled = maps
            else:
                rolled = pltpu.roll(maps, (-d) % HW, axis=1)           # XLU
            accs[t % 4] = accs[t % 4] + wmask_ref[t] * rolled          # VALU
    acc = (accs[0] + accs[1]) + (accs[2] + accs[3])                    # (2, HW)

    conv = jnp.sum(acc, axis=0, keepdims=True) + b_ref[0]              # (1, HW)
    gate = jax.nn.sigmoid(conv)                                        # EUP exp

    # Gate-apply + store in the input dtype (lane-dense, unmasked stores).
    o_ref[0] = (x2d * gate.astype(x2d.dtype)).astype(o_ref.dtype)


def spatial_attn(x, conv_w, bn_gamma, bn_beta, bn_mean, bn_var, eps=1e-5):
    """x: (N, C, H, W); conv_w: (1, 2, K, K); BN params: (1,)."""
    N, C, H, W = x.shape
    HW = H * W

    # Fold BatchNorm (eval mode) into the conv weights / bias (glue, plain JAX).
    scale = bn_gamma / jnp.sqrt(bn_var + eps)                      # (1,)
    shift = bn_beta - bn_mean * scale                              # (1,)
    w = (conv_w * scale.reshape(1, 1, 1, 1)).astype(jnp.float32)   # (1, 2, K, K)
    b = shift.astype(jnp.float32)                                  # (1,)

    # Boundary-validity mask per tap, built once as a numpy constant (flattened
    # H*W layout).  valid[t, 0, i] == 1 iff position i shifted by (dy, dx)
    # stays inside the image ("same" zero padding).
    r = np.arange(H)[:, None]
    c = np.arange(W)[None, :]
    valid = np.zeros((K * K, 1, HW), np.float32)
    for ky in range(K):
        for kx in range(K):
            dy, dx = ky - PAD, kx - PAD
            m = (r + dy >= 0) & (r + dy < H) & (c + dx >= 0) & (c + dx < W)
            valid[ky * K + kx, 0, :] = m.reshape(-1).astype(np.float32)
    valid = jnp.asarray(valid)                                     # (49, 1, HW)

    # Per-tap weights: row 0 multiplies the channel-SUM map (so fold 1/C in),
    # row 1 multiplies the channel-MAX map.  Shape (49, 2, HW).
    w_taps = jnp.transpose(w[0], (1, 2, 0)).reshape(K * K, 2)      # (49, 2)
    w_taps = w_taps * jnp.array([1.0 / C, 1.0], jnp.float32)[None, :]
    wmask = w_taps[:, :, None] * valid                             # (49, 2, HW)

    x_flat = x.reshape(N, C, HW)                                   # lane-dense

    itemsize = x.dtype.itemsize
    cost = pl.CostEstimate(
        flops=int(N * (2 * C * HW + 196 * HW + C * HW + 2 * HW)),
        transcendentals=int(N * HW),
        bytes_accessed=int(2 * N * C * HW * itemsize + K * K * 2 * HW * 4 + 4),
    )

    out_flat = pl.pallas_call(
        functools.partial(spatial_attn_kernel, H=H, W=W),
        out_shape=jax.ShapeDtypeStruct((N, C, HW), x.dtype),
        grid=(N,),
        in_specs=[
            pl.BlockSpec(memory_space=pltpu.MemorySpace.SMEM),        # bias (1,)
            pl.BlockSpec((K * K, 2, HW), lambda n: (0, 0, 0)),        # tap weights
            pl.BlockSpec((1, C, HW), lambda n: (n, 0, 0)),            # x (one batch)
        ],
        out_specs=pl.BlockSpec((1, C, HW), lambda n: (n, 0, 0)),
        compiler_params=pltpu.CompilerParams(dimension_semantics=("parallel",)),
        cost_estimate=cost,
    )(b, wmask, x_flat)

    return out_flat.reshape(N, C, H, W)


def spatial_attn_reference(x, conv_w, bn_gamma, bn_beta, bn_mean, bn_var, eps=1e-5):
    """Plain-JAX reference for numerical verification."""
    attn = jnp.concatenate(
        [jnp.mean(x, axis=1, keepdims=True), jnp.max(x, axis=1, keepdims=True)], axis=1)
    y = jax.lax.conv_general_dilated(
        attn, conv_w, window_strides=(1, 1), padding=[(PAD, PAD), (PAD, PAD)],
        dimension_numbers=("NCHW", "OIHW", "NCHW"))
    scale = bn_gamma / jnp.sqrt(bn_var + eps)
    shift = bn_beta - bn_mean * scale
    y = y * scale.reshape(1, -1, 1, 1) + shift.reshape(1, -1, 1, 1)
    return x * jax.nn.sigmoid(y)


def _run_case(key, N, C, H, W):
    kx, kw = jax.random.split(key)
    x = jax.random.normal(kx, (N, C, H, W), dtype=jnp.float32)
    # Conv2d(2, 1, 7, bias=False) -> weight (1, 2, 7, 7); BatchNorm2d(1) params (1,).
    conv_w = 0.05 * jax.random.normal(kw, (1, 2, K, K), dtype=jnp.float32)
    bn_gamma = jnp.ones((1,), jnp.float32) * 1.3
    bn_beta = jnp.full((1,), 0.1, jnp.float32)
    bn_mean = jnp.full((1,), 0.05, jnp.float32)     # running stats (eval mode)
    bn_var = jnp.full((1,), 0.8, jnp.float32)

    out = jax.block_until_ready(
        spatial_attn(x, conv_w, bn_gamma, bn_beta, bn_mean, bn_var))
    ref = jax.block_until_ready(
        spatial_attn_reference(x, conv_w, bn_gamma, bn_beta, bn_mean, bn_var))

    assert out.shape == (N, C, H, W)
    assert jnp.allclose(out, ref, atol=1e-5, rtol=1e-5), (
        f"mismatch vs reference at shape {(N, C, H, W)}")


if __name__ == "__main__":
    key = jax.random.PRNGKey(0)
    k1, k2 = jax.random.split(key)

    _run_case(k1, N=2, C=4, H=16, W=16)    # main demo size (H*W = 256 lanes)
    _run_case(k2, N=1, C=3, H=16, W=8)     # odd C, H*W = 128 lanes

    print("KERNEL_OK")
</pallas_src>

<mosaic_0001>
module attributes {stable_mosaic.version = 11 : i64} {
  func.func @spatial_attn_kernel(%arg0: i32, %arg1: memref<1xf32, #tpu.memory_space<smem>>, %arg2: memref<49x2x256xf32, #tpu.memory_space<vmem>>, %arg3: memref<1x4x256xf32, #tpu.memory_space<vmem>>, %arg4: memref<1x4x256xf32, #tpu.memory_space<vmem>>) attributes {dimension_semantics = [#tpu.dimension_semantics<parallel>], iteration_bounds = array<i64: 2>, scalar_prefetch = 0 : i64, scratch_operands = 0 : i64, tpu.core_type = #tpu.core_type<tc>, window_params = [{transform_indices = @transform_0, window_bounds = array<i64: 1>}, {pipeline_mode = #tpu.pipeline_mode<synchronous>, transform_indices = @transform_1, window_bounds = array<i64: 49, 2, 256>}, {transform_indices = @transform_2, window_bounds = array<i64: 1, 4, 256>}, {transform_indices = @transform_3, window_bounds = array<i64: 1, 4, 256>}]} {
    %c0 = arith.constant 0 : index
    %c0_0 = arith.constant 0 : index
    %c0_1 = arith.constant 0 : index
    %0 = vector.load %arg3[%c0, %c0_0, %c0_1] : memref<1x4x256xf32, #tpu.memory_space<vmem>>, vector<1x4x256xf32>
    %1 = vector.shape_cast %0 : vector<1x4x256xf32> to vector<4x256xf32>
    %cst = arith.constant dense<0.000000e+00> : vector<256xf32>
    %2 = vector.multi_reduction <add>, %1, %cst [0] : vector<4x256xf32> to vector<256xf32>
    %3 = vector.shape_cast %2 : vector<256xf32> to vector<1x256xf32>
    %cst_2 = arith.constant dense<0xFF800000> : vector<256xf32>
    %4 = vector.multi_reduction <maximumf>, %1, %cst_2 [0] : vector<4x256xf32> to vector<256xf32>
    %5 = vector.shape_cast %4 : vector<256xf32> to vector<1x256xf32>
    %6 = tpu.concatenate %3, %5 in 0 : vector<1x256xf32>, vector<1x256xf32> -> vector<2x256xf32>
    %cst_3 = arith.constant 0.000000e+00 : f32
    %7 = vector.broadcast %cst_3 : f32 to vector<2x256xf32>
    %cst_4 = arith.constant 0.000000e+00 : f32
    %8 = vector.broadcast %cst_4 : f32 to vector<2x256xf32>
    %cst_5 = arith.constant 0.000000e+00 : f32
    %9 = vector.broadcast %cst_5 : f32 to vector<2x256xf32>
    %cst_6 = arith.constant 0.000000e+00 : f32
    %10 = vector.broadcast %cst_6 : f32 to vector<2x256xf32>
    %c51_i32 = arith.constant 51 : i32
    %11 = tpu.dynamic_rotate %6 by %c51_i32 dim 1 : vector<2x256xf32>, i32 -> vector<2x256xf32>
    %c0_7 = arith.constant 0 : index
    %c0_8 = arith.constant 0 : index
    %c0_9 = arith.constant 0 : index
    %12 = vector.load %arg2[%c0_7, %c0_8, %c0_9] : memref<49x2x256xf32, #tpu.memory_space<vmem>>, vector<1x2x256xf32>
    %13 = vector.shape_cast %12 : vector<1x2x256xf32> to vector<2x256xf32>
    %14 = arith.mulf %13, %11 : vector<2x256xf32>
    %15 = arith.addf %7, %14 : vector<2x256xf32>
    %c50_i32 = arith.constant 50 : i32
    %16 = tpu.dynamic_rotate %6 by %c50_i32 dim 1 : vector<2x256xf32>, i32 -> vector<2x256xf32>
    %c1 = arith.constant 1 : index
    %c0_10 = arith.constant 0 : index
    %c0_11 = arith.constant 0 : index
    %17 = vector.load %arg2[%c1, %c0_10, %c0_11] : memref<49x2x256xf32, #tpu.memory_space<vmem>>, vector<1x2x256xf32>
    %18 = vector.shape_cast %17 : vector<1x2x256xf32> to vector<2x256xf32>
    %19 = arith.mulf %18, %16 : vector<2x256xf32>
    %20 = arith.addf %8, %19 : vector<2x256xf32>
    %c49_i32 = arith.constant 49 : i32
    %21 = tpu.dynamic_rotate %6 by %c49_i32 dim 1 : vector<2x256xf32>, i32 -> vector<2x256xf32>
    %c2 = arith.constant 2 : index
    %c0_12 = arith.constant 0 : index
    %c0_13 = arith.constant 0 : index
    %22 = vector.load %arg2[%c2, %c0_12, %c0_13] : memref<49x2x256xf32, #tpu.memory_space<vmem>>, vector<1x2x256xf32>
    %23 = vector.shape_cast %22 : vector<1x2x256xf32> to vector<2x256xf32>
    %24 = arith.mulf %23, %21 : vector<2x256xf32>
    %25 = arith.addf %9, %24 : vector<2x256xf32>
    %c48_i32 = arith.constant 48 : i32
    %26 = tpu.dynamic_rotate %6 by %c48_i32 dim 1 : vector<2x256xf32>, i32 -> vector<2x256xf32>
    %c3 = arith.constant 3 : index
    %c0_14 = arith.constant 0 : index
    %c0_15 = arith.constant 0 : index
    %27 = vector.load %arg2[%c3, %c0_14, %c0_15] : memref<49x2x256xf32, #tpu.memory_space<vmem>>, vector<1x2x256xf32>
    %28 = vector.shape_cast %27 : vector<1x2x256xf32> to vector<2x256xf32>
    %29 = arith.mulf %28, %26 : vector<2x256xf32>
    %30 = arith.addf %10, %29 : vector<2x256xf32>
    %c47_i32 = arith.constant 47 : i32
    %31 = tpu.dynamic_rotate %6 by %c47_i32 dim 1 : vector<2x256xf32>, i32 -> vector<2x256xf32>
    %c4 = arith.constant 4 : index
    %c0_16 = arith.constant 0 : index
    %c0_17 = arith.constant 0 : index
    %32 = vector.load %arg2[%c4, %c0_16, %c0_17] : memref<49x2x256xf32, #tpu.memory_space<vmem>>, vector<1x2x256xf32>
    %33 = vector.shape_cast %32 : vector<1x2x256xf32> to vector<2x256xf32>
    %34 = arith.mulf %33, %31 : vector<2x256xf32>
    %35 = arith.addf %15, %34 : vector<2x256xf32>
    %c46_i32 = arith.constant 46 : i32
    %36 = tpu.dynamic_rotate %6 by %c46_i32 dim 1 : vector<2x256xf32>, i32 -> vector<2x256xf32>
    %c5 = arith.constant 5 : index
    %c0_18 = arith.constant 0 : index
    %c0_19 = arith.constant 0 : index
    %37 = vector.load %arg2[%c5, %c0_18, %c0_19] : memref<49x2x256xf32, #tpu.memory_space<vmem>>, vector<1x2x256xf32>
    %38 = vector.shape_cast %37 : vector<1x2x256xf32> to vector<2x256xf32>
    %39 = arith.mulf %38, %36 : vector<2x256xf32>
    %40 = arith.addf %20, %39 : vector<2x256xf32>
    %c45_i32 = arith.constant 45 : i32
    %41 = tpu.dynamic_rotate %6 by %c45_i32 dim 1 : vector<2x256xf32>, i32 -> vector<2x256xf32>
    %c6 = arith.constant 6 : index
    %c0_20 = arith.constant 0 : index
    %c0_21 = arith.constant 0 : index
    %42 = vector.load %arg2[%c6, %c0_20, %c0_21] : memref<49x2x256xf32, #tpu.memory_space<vmem>>, vector<1x2x256xf32>
    %43 = vector.shape_cast %42 : vector<1x2x256xf32> to vector<2x256xf32>
    %44 = arith.mulf %43, %41 : vector<2x256xf32>
    %45 = arith.addf %25, %44 : vector<2x256xf32>
    %c35_i32 = arith.constant 35 : i32
    %46 = tpu.dynamic_rotate %6 by %c35_i32 dim 1 : vector<2x256xf32>, i32 -> vector<2x256xf32>
    %c7 = arith.constant 7 : index
    %c0_22 = arith.constant 0 : index
    %c0_23 = arith.constant 0 : index
    %47 = vector.load %arg2[%c7, %c0_22, %c0_23] : memref<49x2x256xf32, #tpu.memory_space<vmem>>, vector<1x2x256xf32>
    %48 = vector.shape_cast %47 : vector<1x2x256xf32> to vector<2x256xf32>
    %49 = arith.mulf %48, %46 : vector<2x256xf32>
    %50 = arith.addf %30, %49 : vector<2x256xf32>
    %c34_i32 = arith.constant 34 : i32
    %51 = tpu.dynamic_rotate %6 by %c34_i32 dim 1 : vector<2x256xf32>, i32 -> vector<2x256xf32>
    %c8 = arith.constant 8 : index
    %c0_24 = arith.constant 0 : index
    %c0_25 = arith.constant 0 : index
    %52 = vector.load %arg2[%c8, %c0_24, %c0_25] : memref<49x2x256xf32, #tpu.memory_space<vmem>>, vector<1x2x256xf32>
    %53 = vector.shape_cast %52 : vector<1x2x256xf32> to vector<2x256xf32>
    %54 = arith.mulf %53, %51 : vector<2x256xf32>
    %55 = arith.addf %35, %54 : vector<2x256xf32>
    %c33_i32 = arith.constant 33 : i32
    %56 = tpu.dynamic_rotate %6 by %c33_i32 dim 1 : vector<2x256xf32>, i32 -> vector<2x256xf32>
    %c9 = arith.constant 9 : index
    %c0_26 = arith.constant 0 : index
    %c0_27 = arith.constant 0 : index
    %57 = vector.load %arg2[%c9, %c0_26, %c0_27] : memref<49x2x256xf32, #tpu.memory_space<vmem>>, vector<1x2x256xf32>
    %58 = vector.shape_cast %57 : vector<1x2x256xf32> to vector<2x256xf32>
    %59 = arith.mulf %58, %56 : vector<2x256xf32>
    %60 = arith.addf %40, %59 : vector<2x256xf32>
    %c32_i32 = arith.constant 32 : i32
    %61 = tpu.dynamic_rotate %6 by %c32_i32 dim 1 : vector<2x256xf32>, i32 -> vector<2x256xf32>
    %c10 = arith.constant 10 : index
    %c0_28 = arith.constant 0 : index
    %c0_29 = arith.constant 0 : index
    %62 = vector.load %arg2[%c10, %c0_28, %c0_29] : memref<49x2x256xf32, #tpu.memory_space<vmem>>, vector<1x2x256xf32>
    %63 = vector.shape_cast %62 : vector<1x2x256xf32> to vector<2x256xf32>
    %64 = arith.mulf %63, %61 : vector<2x256xf32>
    %65 = arith.addf %45, %64 : vector<2x256xf32>
    %c31_i32 = arith.constant 31 : i32
    %66 = tpu.dynamic_rotate %6 by %c31_i32 dim 1 : vector<2x256xf32>, i32 -> vector<2x256xf32>
    %c11 = arith.constant 11 : index
    %c0_30 = arith.constant 0 : index
    %c0_31 = arith.constant 0 : index
    %67 = vector.load %arg2[%c11, %c0_30, %c0_31] : memref<49x2x256xf32, #tpu.memory_space<vmem>>, vector<1x2x256xf32>
    %68 = vector.shape_cast %67 : vector<1x2x256xf32> to vector<2x256xf32>
    %69 = arith.mulf %68, %66 : vector<2x256xf32>
    %70 = arith.addf %50, %69 : vector<2x256xf32>
    %c30_i32 = arith.constant 30 : i32
    %71 = tpu.dynamic_rotate %6 by %c30_i32 dim 1 : vector<2x256xf32>, i32 -> vector<2x256xf32>
    %c12 = arith.constant 12 : index
    %c0_32 = arith.constant 0 : index
    %c0_33 = arith.constant 0 : index
    %72 = vector.load %arg2[%c12, %c0_32, %c0_33] : memref<49x2x256xf32, #tpu.memory_space<vmem>>, vector<1x2x256xf32>
    %73 = vector.shape_cast %72 : vector<1x2x256xf32> to vector<2x256xf32>
    %74 = arith.mulf %73, %71 : vector<2x256xf32>
    %75 = arith.addf %55, %74 : vector<2x256xf32>
    %c29_i32 = arith.constant 29 : i32
    %76 = tpu.dynamic_rotate %6 by %c29_i32 dim 1 : vector<2x256xf32>, i32 -> vector<2x256xf32>
    %c13 = arith.constant 13 : index
    %c0_34 = arith.constant 0 : index
    %c0_35 = arith.constant 0 : index
    %77 = vector.load %arg2[%c13, %c0_34, %c0_35] : memref<49x2x256xf32, #tpu.memory_space<vmem>>, vector<1x2x256xf32>
    %78 = vector.shape_cast %77 : vector<1x2x256xf32> to vector<2x256xf32>
    %79 = arith.mulf %78, %76 : vector<2x256xf32>
    %80 = arith.addf %60, %79 : vector<2x256xf32>
    %c19_i32 = arith.constant 19 : i32
    %81 = tpu.dynamic_rotate %6 by %c19_i32 dim 1 : vector<2x256xf32>, i32 -> vector<2x256xf32>
    %c14 = arith.constant 14 : index
    %c0_36 = arith.constant 0 : index
    %c0_37 = arith.constant 0 : index
    %82 = vector.load %arg2[%c14, %c0_36, %c0_37] : memref<49x2x256xf32, #tpu.memory_space<vmem>>, vector<1x2x256xf32>
    %83 = vector.shape_cast %82 : vector<1x2x256xf32> to vector<2x256xf32>
    %84 = arith.mulf %83, %81 : vector<2x256xf32>
    %85 = arith.addf %65, %84 : vector<2x256xf32>
    %c18_i32 = arith.constant 18 : i32
    %86 = tpu.dynamic_rotate %6 by %c18_i32 dim 1 : vector<2x256xf32>, i32 -> vector<2x256xf32>
    %c15 = arith.constant 15 : index
    %c0_38 = arith.constant 0 : index
    %c0_39 = arith.constant 0 : index
    %87 = vector.load %arg2[%c15, %c0_38, %c0_39] : memref<49x2x256xf32, #tpu.memory_space<vmem>>, vector<1x2x256xf32>
    %88 = vector.shape_cast %87 : vector<1x2x256xf32> to vector<2x256xf32>
    %89 = arith.mulf %88, %86 : vector<2x256xf32>
    %90 = arith.addf %70, %89 : vector<2x256xf32>
    %c17_i32 = arith.constant 17 : i32
    %91 = tpu.dynamic_rotate %6 by %c17_i32 dim 1 : vector<2x256xf32>, i32 -> vector<2x256xf32>
    %c16 = arith.constant 16 : index
    %c0_40 = arith.constant 0 : index
    %c0_41 = arith.constant 0 : index
    %92 = vector.load %arg2[%c16, %c0_40, %c0_41] : memref<49x2x256xf32, #tpu.memory_space<vmem>>, vector<1x2x256xf32>
    %93 = vector.shape_cast %92 : vector<1x2x256xf32> to vector<2x256xf32>
    %94 = arith.mulf %93, %91 : vector<2x256xf32>
    %95 = arith.addf %75, %94 : vector<2x256xf32>
    %c16_i32 = arith.constant 16 : i32
    %96 = tpu.dynamic_rotate %6 by %c16_i32 dim 1 : vector<2x256xf32>, i32 -> vector<2x256xf32>
    %c17 = arith.constant 17 : index
    %c0_42 = arith.constant 0 : index
    %c0_43 = arith.constant 0 : index
    %97 = vector.load %arg2[%c17, %c0_42, %c0_43] : memref<49x2x256xf32, #tpu.memory_space<vmem>>, vector<1x2x256xf32>
    %98 = vector.shape_cast %97 : vector<1x2x256xf32> to vector<2x256xf32>
    %99 = arith.mulf %98, %96 : vector<2x256xf32>
    %100 = arith.addf %80, %99 : vector<2x256xf32>
    %c15_i32 = arith.constant 15 : i32
    %101 = tpu.dynamic_rotate %6 by %c15_i32 dim 1 : vector<2x256xf32>, i32 -> vector<2x256xf32>
    %c18 = arith.constant 18 : index
    %c0_44 = arith.constant 0 : index
    %c0_45 = arith.constant 0 : index
    %102 = vector.load %arg2[%c18, %c0_44, %c0_45] : memref<49x2x256xf32, #tpu.memory_space<vmem>>, vector<1x2x256xf32>
    %103 = vector.shape_cast %102 : vector<1x2x256xf32> to vector<2x256xf32>
    %104 = arith.mulf %103, %101 : vector<2x256xf32>
    %105 = arith.addf %85, %104 : vector<2x256xf32>
    %c14_i32 = arith.constant 14 : i32
    %106 = tpu.dynamic_rotate %6 by %c14_i32 dim 1 : vector<2x256xf32>, i32 -> vector<2x256xf32>
    %c19 = arith.constant 19 : index
    %c0_46 = arith.constant 0 : index
    %c0_47 = arith.constant 0 : index
    %107 = vector.load %arg2[%c19, %c0_46, %c0_47] : memref<49x2x256xf32, #tpu.memory_space<vmem>>, vector<1x2x256xf32>
    %108 = vector.shape_cast %107 : vector<1x2x256xf32> to vector<2x256xf32>
    %109 = arith.mulf %108, %106 : vector<2x256xf32>
    %110 = arith.addf %90, %109 : vector<2x256xf32>
    %c13_i32 = arith.constant 13 : i32
    %111 = tpu.dynamic_rotate %6 by %c13_i32 dim 1 : vector<2x256xf32>, i32 -> vector<2x256xf32>
    %c20 = arith.constant 20 : index
    %c0_48 = arith.constant 0 : index
    %c0_49 = arith.constant 0 : index
    %112 = vector.load %arg2[%c20, %c0_48, %c0_49] : memref<49x2x256xf32, #tpu.memory_space<vmem>>, vector<1x2x256xf32>
    %113 = vector.shape_cast %112 : vector<1x2x256xf32> to vector<2x256xf32>
    %114 = arith.mulf %113, %111 : vector<2x256xf32>
    %115 = arith.addf %95, %114 : vector<2x256xf32>
    %c3_i32 = arith.constant 3 : i32
    %116 = tpu.dynamic_rotate %6 by %c3_i32 dim 1 : vector<2x256xf32>, i32 -> vector<2x256xf32>
    %c21 = arith.constant 21 : index
    %c0_50 = arith.constant 0 : index
    %c0_51 = arith.constant 0 : index
    %117 = vector.load %arg2[%c21, %c0_50, %c0_51] : memref<49x2x256xf32, #tpu.memory_space<vmem>>, vector<1x2x256xf32>
    %118 = vector.shape_cast %117 : vector<1x2x256xf32> to vector<2x256xf32>
    %119 = arith.mulf %118, %116 : vector<2x256xf32>
    %120 = arith.addf %100, %119 : vector<2x256xf32>
    %c2_i32 = arith.constant 2 : i32
    %121 = tpu.dynamic_rotate %6 by %c2_i32 dim 1 : vector<2x256xf32>, i32 -> vector<2x256xf32>
    %c22 = arith.constant 22 : index
    %c0_52 = arith.constant 0 : index
    %c0_53 = arith.constant 0 : index
    %122 = vector.load %arg2[%c22, %c0_52, %c0_53] : memref<49x2x256xf32, #tpu.memory_space<vmem>>, vector<1x2x256xf32>
    %123 = vector.shape_cast %122 : vector<1x2x256xf32> to vector<2x256xf32>
    %124 = arith.mulf %123, %121 : vector<2x256xf32>
    %125 = arith.addf %105, %124 : vector<2x256xf32>
    %c1_i32 = arith.constant 1 : i32
    %126 = tpu.dynamic_rotate %6 by %c1_i32 dim 1 : vector<2x256xf32>, i32 -> vector<2x256xf32>
    %c23 = arith.constant 23 : index
    %c0_54 = arith.constant 0 : index
    %c0_55 = arith.constant 0 : index
    %127 = vector.load %arg2[%c23, %c0_54, %c0_55] : memref<49x2x256xf32, #tpu.memory_space<vmem>>, vector<1x2x256xf32>
    %128 = vector.shape_cast %127 : vector<1x2x256xf32> to vector<2x256xf32>
    %129 = arith.mulf %128, %126 : vector<2x256xf32>
    %130 = arith.addf %110, %129 : vector<2x256xf32>
    %c24 = arith.constant 24 : index
    %c0_56 = arith.constant 0 : index
    %c0_57 = arith.constant 0 : index
    %131 = vector.load %arg2[%c24, %c0_56, %c0_57] : memref<49x2x256xf32, #tpu.memory_space<vmem>>, vector<1x2x256xf32>
    %132 = vector.shape_cast %131 : vector<1x2x256xf32> to vector<2x256xf32>
    %133 = arith.mulf %132, %6 : vector<2x256xf32>
    %134 = arith.addf %115, %133 : vector<2x256xf32>
    %c255_i32 = arith.constant 255 : i32
    %135 = tpu.dynamic_rotate %6 by %c255_i32 dim 1 : vector<2x256xf32>, i32 -> vector<2x256xf32>
    %c25 = arith.constant 25 : index
    %c0_58 = arith.constant 0 : index
    %c0_59 = arith.constant 0 : index
    %136 = vector.load %arg2[%c25, %c0_58, %c0_59] : memref<49x2x256xf32, #tpu.memory_space<vmem>>, vector<1x2x256xf32>
    %137 = vector.shape_cast %136 : vector<1x2x256xf32> to vector<2x256xf32>
    %138 = arith.mulf %137, %135 : vector<2x256xf32>
    %139 = arith.addf %120, %138 : vector<2x256xf32>
    %c254_i32 = arith.constant 254 : i32
    %140 = tpu.dynamic_rotate %6 by %c254_i32 dim 1 : vector<2x256xf32>, i32 -> vector<2x256xf32>
    %c26 = arith.constant 26 : index
    %c0_60 = arith.constant 0 : index
    %c0_61 = arith.constant 0 : index
    %141 = vector.load %arg2[%c26, %c0_60, %c0_61] : memref<49x2x256xf32, #tpu.memory_space<vmem>>, vector<1x2x256xf32>
    %142 = vector.shape_cast %141 : vector<1x2x256xf32> to vector<2x256xf32>
    %143 = arith.mulf %142, %140 : vector<2x256xf32>
    %144 = arith.addf %125, %143 : vector<2x256xf32>
    %c253_i32 = arith.constant 253 : i32
    %145 = tpu.dynamic_rotate %6 by %c253_i32 dim 1 : vector<2x256xf32>, i32 -> vector<2x256xf32>
    %c27 = arith.constant 27 : index
    %c0_62 = arith.constant 0 : index
    %c0_63 = arith.constant 0 : index
    %146 = vector.load %arg2[%c27, %c0_62, %c0_63] : memref<49x2x256xf32, #tpu.memory_space<vmem>>, vector<1x2x256xf32>
    %147 = vector.shape_cast %146 : vector<1x2x256xf32> to vector<2x256xf32>
    %148 = arith.mulf %147, %145 : vector<2x256xf32>
    %149 = arith.addf %130, %148 : vector<2x256xf32>
    %c243_i32 = arith.constant 243 : i32
    %150 = tpu.dynamic_rotate %6 by %c243_i32 dim 1 : vector<2x256xf32>, i32 -> vector<2x256xf32>
    %c28 = arith.constant 28 : index
    %c0_64 = arith.constant 0 : index
    %c0_65 = arith.constant 0 : index
    %151 = vector.load %arg2[%c28, %c0_64, %c0_65] : memref<49x2x256xf32, #tpu.memory_space<vmem>>, vector<1x2x256xf32>
    %152 = vector.shape_cast %151 : vector<1x2x256xf32> to vector<2x256xf32>
    %153 = arith.mulf %152, %150 : vector<2x256xf32>
    %154 = arith.addf %134, %153 : vector<2x256xf32>
    %c242_i32 = arith.constant 242 : i32
    %155 = tpu.dynamic_rotate %6 by %c242_i32 dim 1 : vector<2x256xf32>, i32 -> vector<2x256xf32>
    %c29 = arith.constant 29 : index
    %c0_66 = arith.constant 0 : index
    %c0_67 = arith.constant 0 : index
    %156 = vector.load %arg2[%c29, %c0_66, %c0_67] : memref<49x2x256xf32, #tpu.memory_space<vmem>>, vector<1x2x256xf32>
    %157 = vector.shape_cast %156 : vector<1x2x256xf32> to vector<2x256xf32>
    %158 = arith.mulf %157, %155 : vector<2x256xf32>
    %159 = arith.addf %139, %158 : vector<2x256xf32>
    %c241_i32 = arith.constant 241 : i32
    %160 = tpu.dynamic_rotate %6 by %c241_i32 dim 1 : vector<2x256xf32>, i32 -> vector<2x256xf32>
    %c30 = arith.constant 30 : index
    %c0_68 = arith.constant 0 : index
    %c0_69 = arith.constant 0 : index
    %161 = vector.load %arg2[%c30, %c0_68, %c0_69] : memref<49x2x256xf32, #tpu.memory_space<vmem>>, vector<1x2x256xf32>
    %162 = vector.shape_cast %161 : vector<1x2x256xf32> to vector<2x256xf32>
    %163 = arith.mulf %162, %160 : vector<2x256xf32>
    %164 = arith.addf %144, %163 : vector<2x256xf32>
    %c240_i32 = arith.constant 240 : i32
    %165 = tpu.dynamic_rotate %6 by %c240_i32 dim 1 : vector<2x256xf32>, i32 -> vector<2x256xf32>
    %c31 = arith.constant 31 : index
    %c0_70 = arith.constant 0 : index
    %c0_71 = arith.constant 0 : index
    %166 = vector.load %arg2[%c31, %c0_70, %c0_71] : memref<49x2x256xf32, #tpu.memory_space<vmem>>, vector<1x2x256xf32>
    %167 = vector.shape_cast %166 : vector<1x2x256xf32> to vector<2x256xf32>
    %168 = arith.mulf %167, %165 : vector<2x256xf32>
    %169 = arith.addf %149, %168 : vector<2x256xf32>
    %c239_i32 = arith.constant 239 : i32
    %170 = tpu.dynamic_rotate %6 by %c239_i32 dim 1 : vector<2x256xf32>, i32 -> vector<2x256xf32>
    %c32 = arith.constant 32 : index
    %c0_72 = arith.constant 0 : index
    %c0_73 = arith.constant 0 : index
    %171 = vector.load %arg2[%c32, %c0_72, %c0_73] : memref<49x2x256xf32, #tpu.memory_space<vmem>>, vector<1x2x256xf32>
    %172 = vector.shape_cast %171 : vector<1x2x256xf32> to vector<2x256xf32>
    %173 = arith.mulf %172, %170 : vector<2x256xf32>
    %174 = arith.addf %154, %173 : vector<2x256xf32>
    %c238_i32 = arith.constant 238 : i32
    %175 = tpu.dynamic_rotate %6 by %c238_i32 dim 1 : vector<2x256xf32>, i32 -> vector<2x256xf32>
    %c33 = arith.constant 33 : index
    %c0_74 = arith.constant 0 : index
    %c0_75 = arith.constant 0 : index
    %176 = vector.load %arg2[%c33, %c0_74, %c0_75] : memref<49x2x256xf32, #tpu.memory_space<vmem>>, vector<1x2x256xf32>
    %177 = vector.shape_cast %176 : vector<1x2x256xf32> to vector<2x256xf32>
    %178 = arith.mulf %177, %175 : vector<2x256xf32>
    %179 = arith.addf %159, %178 : vector<2x256xf32>
    %c237_i32 = arith.constant 237 : i32
    %180 = tpu.dynamic_rotate %6 by %c237_i32 dim 1 : vector<2x256xf32>, i32 -> vector<2x256xf32>
    %c34 = arith.constant 34 : index
    %c0_76 = arith.constant 0 : index
    %c0_77 = arith.constant 0 : index
    %181 = vector.load %arg2[%c34, %c0_76, %c0_77] : memref<49x2x256xf32, #tpu.memory_space<vmem>>, vector<1x2x256xf32>
    %182 = vector.shape_cast %181 : vector<1x2x256xf32> to vector<2x256xf32>
    %183 = arith.mulf %182, %180 : vector<2x256xf32>
    %184 = arith.addf %164, %183 : vector<2x256xf32>
    %c227_i32 = arith.constant 227 : i32
    %185 = tpu.dynamic_rotate %6 by %c227_i32 dim 1 : vector<2x256xf32>, i32 -> vector<2x256xf32>
    %c35 = arith.constant 35 : index
    %c0_78 = arith.constant 0 : index
    %c0_79 = arith.constant 0 : index
    %186 = vector.load %arg2[%c35, %c0_78, %c0_79] : memref<49x2x256xf32, #tpu.memory_space<vmem>>, vector<1x2x256xf32>
    %187 = vector.shape_cast %186 : vector<1x2x256xf32> to vector<2x256xf32>
    %188 = arith.mulf %187, %185 : vector<2x256xf32>
    %189 = arith.addf %169, %188 : vector<2x256xf32>
    %c226_i32 = arith.constant 226 : i32
    %190 = tpu.dynamic_rotate %6 by %c226_i32 dim 1 : vector<2x256xf32>, i32 -> vector<2x256xf32>
    %c36 = arith.constant 36 : index
    %c0_80 = arith.constant 0 : index
    %c0_81 = arith.constant 0 : index
    %191 = vector.load %arg2[%c36, %c0_80, %c0_81] : memref<49x2x256xf32, #tpu.memory_space<vmem>>, vector<1x2x256xf32>
    %192 = vector.shape_cast %191 : vector<1x2x256xf32> to vector<2x256xf32>
    %193 = arith.mulf %192, %190 : vector<2x256xf32>
    %194 = arith.addf %174, %193 : vector<2x256xf32>
    %c225_i32 = arith.constant 225 : i32
    %195 = tpu.dynamic_rotate %6 by %c225_i32 dim 1 : vector<2x256xf32>, i32 -> vector<2x256xf32>
    %c37 = arith.constant 37 : index
    %c0_82 = arith.constant 0 : index
    %c0_83 = arith.constant 0 : index
    %196 = vector.load %arg2[%c37, %c0_82, %c0_83] : memref<49x2x256xf32, #tpu.memory_space<vmem>>, vector<1x2x256xf32>
    %197 = vector.shape_cast %196 : vector<1x2x256xf32> to vector<2x256xf32>
    %198 = arith.mulf %197, %195 : vector<2x256xf32>
    %199 = arith.addf %179, %198 : vector<2x256xf32>
    %c224_i32 = arith.constant 224 : i32
    %200 = tpu.dynamic_rotate %6 by %c224_i32 dim 1 : vector<2x256xf32>, i32 -> vector<2x256xf32>
    %c38 = arith.constant 38 : index
    %c0_84 = arith.constant 0 : index
    %c0_85 = arith.constant 0 : index
    %201 = vector.load %arg2[%c38, %c0_84, %c0_85] : memref<49x2x256xf32, #tpu.memory_space<vmem>>, vector<1x2x256xf32>
    %202 = vector.shape_cast %201 : vector<1x2x256xf32> to vector<2x256xf32>
    %203 = arith.mulf %202, %200 : vector<2x256xf32>
    %204 = arith.addf %184, %203 : vector<2x256xf32>
    %c223_i32 = arith.constant 223 : i32
    %205 = tpu.dynamic_rotate %6 by %c223_i32 dim 1 : vector<2x256xf32>, i32 -> vector<2x256xf32>
    %c39 = arith.constant 39 : index
    %c0_86 = arith.constant 0 : index
    %c0_87 = arith.constant 0 : index
    %206 = vector.load %arg2[%c39, %c0_86, %c0_87] : memref<49x2x256xf32, #tpu.memory_space<vmem>>, vector<1x2x256xf32>
    %207 = vector.shape_cast %206 : vector<1x2x256xf32> to vector<2x256xf32>
    %208 = arith.mulf %207, %205 : vector<2x256xf32>
    %209 = arith.addf %189, %208 : vector<2x256xf32>
    %c222_i32 = arith.constant 222 : i32
    %210 = tpu.dynamic_rotate %6 by %c222_i32 dim 1 : vector<2x256xf32>, i32 -> vector<2x256xf32>
    %c40 = arith.constant 40 : index
    %c0_88 = arith.constant 0 : index
    %c0_89 = arith.constant 0 : index
    %211 = vector.load %arg2[%c40, %c0_88, %c0_89] : memref<49x2x256xf32, #tpu.memory_space<vmem>>, vector<1x2x256xf32>
    %212 = vector.shape_cast %211 : vector<1x2x256xf32> to vector<2x256xf32>
    %213 = arith.mulf %212, %210 : vector<2x256xf32>
    %214 = arith.addf %194, %213 : vector<2x256xf32>
    %c221_i32 = arith.constant 221 : i32
    %215 = tpu.dynamic_rotate %6 by %c221_i32 dim 1 : vector<2x256xf32>, i32 -> vector<2x256xf32>
    %c41 = arith.constant 41 : index
    %c0_90 = arith.constant 0 : index
    %c0_91 = arith.constant 0 : index
    %216 = vector.load %arg2[%c41, %c0_90, %c0_91] : memref<49x2x256xf32, #tpu.memory_space<vmem>>, vector<1x2x256xf32>
    %217 = vector.shape_cast %216 : vector<1x2x256xf32> to vector<2x256xf32>
    %218 = arith.mulf %217, %215 : vector<2x256xf32>
    %219 = arith.addf %199, %218 : vector<2x256xf32>
    %c211_i32 = arith.constant 211 : i32
    %220 = tpu.dynamic_rotate %6 by %c211_i32 dim 1 : vector<2x256xf32>, i32 -> vector<2x256xf32>
    %c42 = arith.constant 42 : index
    %c0_92 = arith.constant 0 : index
    %c0_93 = arith.constant 0 : index
    %221 = vector.load %arg2[%c42, %c0_92, %c0_93] : memref<49x2x256xf32, #tpu.memory_space<vmem>>, vector<1x2x256xf32>
    %222 = vector.shape_cast %221 : vector<1x2x256xf32> to vector<2x256xf32>
    %223 = arith.mulf %222, %220 : vector<2x256xf32>
    %224 = arith.addf %204, %223 : vector<2x256xf32>
    %c210_i32 = arith.constant 210 : i32
    %225 = tpu.dynamic_rotate %6 by %c210_i32 dim 1 : vector<2x256xf32>, i32 -> vector<2x256xf32>
    %c43 = arith.constant 43 : index
    %c0_94 = arith.constant 0 : index
    %c0_95 = arith.constant 0 : index
    %226 = vector.load %arg2[%c43, %c0_94, %c0_95] : memref<49x2x256xf32, #tpu.memory_space<vmem>>, vector<1x2x256xf32>
    %227 = vector.shape_cast %226 : vector<1x2x256xf32> to vector<2x256xf32>
    %228 = arith.mulf %227, %225 : vector<2x256xf32>
    %229 = arith.addf %209, %228 : vector<2x256xf32>
    %c209_i32 = arith.constant 209 : i32
    %230 = tpu.dynamic_rotate %6 by %c209_i32 dim 1 : vector<2x256xf32>, i32 -> vector<2x256xf32>
    %c44 = arith.constant 44 : index
    %c0_96 = arith.constant 0 : index
    %c0_97 = arith.constant 0 : index
    %231 = vector.load %arg2[%c44, %c0_96, %c0_97] : memref<49x2x256xf32, #tpu.memory_space<vmem>>, vector<1x2x256xf32>
    %232 = vector.shape_cast %231 : vector<1x2x256xf32> to vector<2x256xf32>
    %233 = arith.mulf %232, %230 : vector<2x256xf32>
    %234 = arith.addf %214, %233 : vector<2x256xf32>
    %c208_i32 = arith.constant 208 : i32
    %235 = tpu.dynamic_rotate %6 by %c208_i32 dim 1 : vector<2x256xf32>, i32 -> vector<2x256xf32>
    %c45 = arith.constant 45 : index
    %c0_98 = arith.constant 0 : index
    %c0_99 = arith.constant 0 : index
    %236 = vector.load %arg2[%c45, %c0_98, %c0_99] : memref<49x2x256xf32, #tpu.memory_space<vmem>>, vector<1x2x256xf32>
    %237 = vector.shape_cast %236 : vector<1x2x256xf32> to vector<2x256xf32>
    %238 = arith.mulf %237, %235 : vector<2x256xf32>
    %239 = arith.addf %219, %238 : vector<2x256xf32>
    %c207_i32 = arith.constant 207 : i32
    %240 = tpu.dynamic_rotate %6 by %c207_i32 dim 1 : vector<2x256xf32>, i32 -> vector<2x256xf32>
    %c46 = arith.constant 46 : index
    %c0_100 = arith.constant 0 : index
    %c0_101 = arith.constant 0 : index
    %241 = vector.load %arg2[%c46, %c0_100, %c0_101] : memref<49x2x256xf32, #tpu.memory_space<vmem>>, vector<1x2x256xf32>
    %242 = vector.shape_cast %241 : vector<1x2x256xf32> to vector<2x256xf32>
    %243 = arith.mulf %242, %240 : vector<2x256xf32>
    %244 = arith.addf %224, %243 : vector<2x256xf32>
    %c206_i32 = arith.constant 206 : i32
    %245 = tpu.dynamic_rotate %6 by %c206_i32 dim 1 : vector<2x256xf32>, i32 -> vector<2x256xf32>
    %c47 = arith.constant 47 : index
    %c0_102 = arith.constant 0 : index
    %c0_103 = arith.constant 0 : index
    %246 = vector.load %arg2[%c47, %c0_102, %c0_103] : memref<49x2x256xf32, #tpu.memory_space<vmem>>, vector<1x2x256xf32>
    %247 = vector.shape_cast %246 : vector<1x2x256xf32> to vector<2x256xf32>
    %248 = arith.mulf %247, %245 : vector<2x256xf32>
    %249 = arith.addf %229, %248 : vector<2x256xf32>
    %c205_i32 = arith.constant 205 : i32
    %250 = tpu.dynamic_rotate %6 by %c205_i32 dim 1 : vector<2x256xf32>, i32 -> vector<2x256xf32>
    %c48 = arith.constant 48 : index
    %c0_104 = arith.constant 0 : index
    %c0_105 = arith.constant 0 : index
    %251 = vector.load %arg2[%c48, %c0_104, %c0_105] : memref<49x2x256xf32, #tpu.memory_space<vmem>>, vector<1x2x256xf32>
    %252 = vector.shape_cast %251 : vector<1x2x256xf32> to vector<2x256xf32>
    %253 = arith.mulf %252, %250 : vector<2x256xf32>
    %254 = arith.addf %234, %253 : vector<2x256xf32>
    %255 = arith.addf %254, %239 : vector<2x256xf32>
    %256 = arith.addf %244, %249 : vector<2x256xf32>
    %257 = arith.addf %255, %256 : vector<2x256xf32>
    %cst_106 = arith.constant dense<0.000000e+00> : vector<256xf32>
    %258 = vector.multi_reduction <add>, %257, %cst_106 [0] : vector<2x256xf32> to vector<256xf32>
    %259 = vector.shape_cast %258 : vector<256xf32> to vector<1x256xf32>
    %c0_107 = arith.constant 0 : index
    %260 = memref.load %arg1[%c0_107] : memref<1xf32, #tpu.memory_space<smem>>
    %261 = vector.broadcast %260 : f32 to vector<1x256xf32>
    %262 = arith.addf %259, %261 : vector<1x256xf32>
    %263 = arith.negf %262 : vector<1x256xf32>
    %264 = math.exp %263 : vector<1x256xf32>
    %cst_108 = arith.constant 1.000000e+00 : f32
    %265 = vector.broadcast %cst_108 : f32 to vector<1x256xf32>
    %266 = arith.addf %265, %264 : vector<1x256xf32>
    %267 = arith.divf %265, %266 : vector<1x256xf32>
    %268 = vector.broadcast %267 : vector<1x256xf32> to vector<4x256xf32>
    %269 = arith.mulf %1, %268 : vector<4x256xf32>
    %c0_109 = arith.constant 0 : index
    %c0_110 = arith.constant 0 : index
    %c0_111 = arith.constant 0 : index
    %270 = vector.load %arg4[%c0_109, %c0_110, %c0_111] : memref<1x4x256xf32, #tpu.memory_space<vmem>>, vector<1x4x256xf32>
    %271 = vector.shape_cast %270 : vector<1x4x256xf32> to vector<4x256xf32>
    %272 = vector.shape_cast %269 : vector<4x256xf32> to vector<1x4x256xf32>
    tpu.vector_store %arg4[%c0_109, %c0_110, %c0_111], %272 {strides = array<i32>} : memref<1x4x256xf32, #tpu.memory_space<vmem>>, vector<1x4x256xf32>,
    return
  }
  func.func @transform_0(%arg0: i32) -> i32 {
    %c0_i32 = arith.constant 0 : i32
    %c0_i32_0 = arith.constant 0 : i32
    return %c0_i32 : i32
  }
  func.func @transform_1(%arg0: i32) -> (i32, i32, i32) {
    %c0_i32 = arith.constant 0 : i32
    %c0_i32_0 = arith.constant 0 : i32
    %c0_i32_1 = arith.constant 0 : i32
    %c0_i32_2 = arith.constant 0 : i32
    return %c0_i32, %c0_i32_0, %c0_i32_1 : i32, i32, i32
  }
  func.func @transform_2(%arg0: i32) -> (i32, i32, i32) {
    %c0_i32 = arith.constant 0 : i32
    %c0_i32_0 = arith.constant 0 : i32
    %c0_i32_1 = arith.constant 0 : i32
    return %arg0, %c0_i32, %c0_i32_0 : i32, i32, i32
  }
  func.func @transform_3(%arg0: i32) -> (i32, i32, i32) {
    %c0_i32 = arith.constant 0 : i32
    %c0_i32_0 = arith.constant 0 : i32
    %c0_i32_1 = arith.constant 0 : i32
    return %arg0, %c0_i32, %c0_i32_0 : i32, i32, i32
  }
}

</mosaic_0001>

<bundles_post_ra>
// kernel: tpu_custom_call.1
= control target key start
LH: loop header
LB: loop body
LE: loop exit
PB: predicated region body
PF: predicated region fallthrough
CT: control target
= control target key end

     0   :  { %s2317_s0 = inlined_call_operand.<no memory space> [shape: f32[1], index: 0, kind: input, shape index: {}]   ;;  %s2318_s1 = inlined_call_operand.hbm [shape: f32[49,2,256], index: 1, kind: input, shape index: {}]   ;;  %s2319_s2 = inlined_call_operand.hbm [shape: f32[2,4,256], index: 2, kind: input, shape index: {}]   ;;  %s2320_s3 = inlined_call_operand.hbm [shape: f32[2,4,256], index: 3, kind: output, shape index: {}]  }
   0x1   :  { %8 = sst [smem:[#allocation2]] %s2317_s0 }
   0x2   :  { %9 = vsyncpa [#allocation4], 0 }
   0x3   :  { %10 = vsyncpa [#allocation7], 0 }
   0x4   :  { %12 = vsyncpa [#allocation7 + $0x1], 0 }
   0x5   :  { %13 = vsyncpa [#allocation5], 0 }
   0x6   :  { %15 = vsyncpa [#allocation5 + $0x1], 0  ;;  %s1804_s14 = smov 0   ;;  %s1806_s15 = smov 0  }
   0x7   :  { %s1808_s16 = smov 0   ;;  %s1810_s17 = smov 0  }
   0x8 LB: > { %s1825_s0 = sadd.s32 4294967295, %s1725_s17   ;;  %s1459_s18 = sadd.s32 4294967294, %s1725_s17   ;;  %s1725_s17 = sphi %s1810_s17, %s2340_s17   ;;  %s1721_s16 = sphi %s1808_s16, %s2339_s16   ;;  %s1717_s15 = sphi %s1806_s15, %s2338_s15   ;;  %s1713_s14 = sphi %s1804_s14, %s2337_s14  }
   0x9   : > { %p83_p0 = scmp.ne.s32.totalorder %s1717_s15, %s1713_s14  ;;  %p2321_p1 = scmp.eq.s32.totalorder %s1825_s0, 0 }
   0xa   : > { %p113_p3 = scmp.eq.s32.totalorder %s1459_s18, 1  ;;  %p1460_p5 = scmp.ge.s32.totalorder %s1725_s17, 1 }
   0xb   : > { %p1834_p4 = por %p2321_p1, %p83_p0  ;;  %p120_p7 = scmp.lt.s32.totalorder %s1725_s17, 3 }
   0xc   : > { %p1839_p6 = por %p113_p3, %p83_p0  ;;  %s1727_s22 = smov [#allocation3]  }
   0xd   : > { %s2324_s19 = scalar_select %p1834_p4, 1, 0 }
   0xe   : > { %s2325_s20 = scalar_select %p1839_p6, 1, 0 }
   0xf   : > { %p1844_p8 = pnand %p1460_p5, %p120_p7  ;;  %s135_s23 = sshll.u32 %s1727_s22, 4  ;;  %s1848_s23 = int_to_ptr.vmem [resolvable:$true] %s135_s23 }
  0x10   : > { %s1860_s25 = sadd.s32 1, %s1725_s17   ;;  %s70_s26 = sadd.s32 1, %s1721_s16 }
  0x11   : > { %s2326_s21 = scalar_select %p1844_p8, 1, 0 }
  0x12   : > { %p1487_p9 = pneg %p1844_p8  ;;  %s67_s27 = ssub.s32 %s1725_s17, %s1860_s25 }
  0x13   : > { %s1597_s30 = scalar_lea.hbm %s2318_s1, 3136 }
  0x14   : > { %p1855_p11 = pnand %p1487_p9, %p2321_p1  ;;  %p1598_p12 = scmp.ne.s32.totalorder %s2318_s1, %s1597_s30 }
  0x15   : > { %p1604_p5 = scmp.lt.u32.totalorder %s1597_s30, %s2318_s1 }
  0x16   : > { %p1599_p13 = pneg %p1855_p11 }
  0x18   : > { %p1600_p0 = pnand %p1599_p13, %p1598_p12 }
  0x1a   : > { %p1601_p3 = pneg %p1600_p0 }
  0x1c   : > { %p1606_p7 = pnand %p1604_p5, %p1601_p3 }
  0x1e   : > { %1609 = shalt.err (!%p1606_p7)
}
  0x1f   : > { %s1610_s8 = scalar_lea.vmem %s1848_s23, 3136  ;;  %p1618_p2 = scmp.lt.s32.totalorder %s1848_s23, %s1848_s23 }
  0x20   : > { %p1611_p9 = scmp.ne.s32.totalorder %s1848_s23, %s1610_s8  ;;  %p1619_p6 = scmp.lt.s32.totalorder %s1610_s8, %s1610_s8 }
  0x22   : > { %p1613_p10 = pnand %p1611_p9, %p1599_p13  ;;  %p1620_p4 = por %p1619_p6, %p1618_p2 }
  0x24   : > { %p1614_p1 = pneg %p1613_p10 }
  0x26   : > { %p1621_p8 = pnand %p1620_p4, %p1614_p1 }
  0x28   : > { %1624 = shalt.err (!%p1621_p8)
}
  0x29   : > { %s1728_s9 = smov 64   ;;  %s1729_s10 = smov 4  }
  0x2a   : > { %1490 = dma.hbm_to_vmem [thread:$0]  (!%p1855_p11), %s2318_s1, 3136, %s1848_s23, [#allocation4], %s1728_s9, %s1728_s9, %s1729_s10  }
  0x2b   : > { %p68_p2 = scmp.eq.s32.totalorder %s67_s27, 0  ;;  %p77_p1 = scmp.ne.s32.totalorder %s1721_s16, %s1717_s15 }
  0x2c   : > { %p78_p4 = scmp.eq.s32.totalorder %s1725_s17, 0  ;;  %p1500_p6 = scmp.lt.s32.totalorder %s1725_s17, 2 }
  0x2d   : > { %s1891_s13 = scalar_select %p68_p2, %s1721_s16, %s70_s26  }
  0x2e   : > { %p79_p8 = por %p78_p4, %p77_p1  ;;  %p2328_p10 = scmp.eq.s32.totalorder %s1825_s0, 1 }
  0x2f   : > { %s149_s22 = sand.u32 1, %s1721_s16   ;;  %s1477_s28 = sshll.u32 %s1725_s17, 7 }
  0x30   : > { %p1895_p12 = por %p2328_p10, %p77_p1  ;;  %s1463_s29 = sshll.u32 %s149_s22, 3 }
  0x31   : > { %s1904_s4 = scalar_lea.hbm %s2319_s2, %s1477_s28  ;;  %s153_s23 = scalar_lea.vmem [#allocation6], %s1463_s29 }
  0x32   : > { %s161_s26 = sshll.u32 %s153_s23, 4  ;;  %p1906_p11 = pnand %p1500_p6, %p79_p8  ;;  %s1910_s26 = int_to_ptr.vmem [resolvable:$true] %s161_s26 }
  0x33   : > { %s150_s5 = scalar_lea.sflag [#allocation7], %s149_s22  ;;  %s1625_s6 = scalar_lea.hbm %s1904_s4, 128 }
  0x34   : > { %p1626_p13 = scmp.ne.s32.totalorder %s1904_s4, %s1625_s6  ;;  %p1627_p0 = pneg %p1906_p11 }
  0x35   : > { %s1630_s9 = scalar_lea.hbm %s2319_s2, 256  ;;  %p1631_p7 = scmp.lt.u32.totalorder %s1904_s4, %s2319_s2 }
  0x36   : > { %p1628_p3 = pnand %p1627_p0, %p1626_p13  ;;  %p1632_p9 = scmp.lt.u32.totalorder %s1630_s9, %s1625_s6 }
  0x37   : > { %p1634_p1 = scmp.lt.u32.totalorder %s1625_s6, %s1904_s4 }
  0x38   : > { %p1629_p5 = pneg %p1628_p3  ;;  %p1633_p2 = por %p1632_p9, %p1631_p7 }
  0x3a   : > { %p1635_p4 = por %p1634_p1, %p1633_p2 }
  0x3c   : > { %p1636_p6 = pnand %p1635_p4, %p1629_p5 }
  0x3e   : > { %1639 = shalt.err (!%p1636_p6)
}
  0x3f   : > { %s1640_s12 = scalar_lea.vmem %s1910_s26, 128  ;;  %s1730_s22 = smov [#allocation6]  }
  0x40   : > { %p1641_p8 = scmp.ne.s32.totalorder %s1910_s26, %s1640_s12  ;;  %s1645_s28 = sshll.u32 %s1730_s22, 4  ;;  %s1646_s28 = int_to_ptr.vmem [resolvable:$false] %s1645_s28 }
  0x41   : > { %s1647_s29 = scalar_lea.vmem %s1646_s28, 256  ;;  %p1648_p3 = scmp.lt.s32.totalorder %s1910_s26, %s1646_s28 }
  0x42   : > { %p1643_p10 = pnand %p1641_p8, %p1627_p0  ;;  %p1649_p7 = scmp.lt.s32.totalorder %s1647_s29, %s1640_s12 }
  0x44   : > { %p1644_p13 = pneg %p1643_p10  ;;  %p1650_p9 = por %p1649_p7, %p1648_p3 }
  0x46   : > { %p1651_p2 = pnand %p1650_p9, %p1644_p13 }
  0x48   : > { %1654 = shalt.err (!%p1651_p2)
}
  0x49   : > { %1494 = dma.hbm_to_vmem [thread:$0]  (!%p1906_p11), %s1904_s4, 128, %s1910_s26, %s150_s5  }
  0x4a   : > { %p2331_p5 = scmp.ne.s32.totalorder %s2326_s21, 0 }
  0x4b   : > { %p2332_p0 = scmp.eq.s32.totalorder (!%p2331_p5), %s1825_s0, 0 }
  0x4c   : > { %170 = sbr.rel (%p2331_p5) target bundleno = 482 (0x1e2), region = 32 }
  0x53   : > { %1700 = dma.done.wait (%p2332_p0), [#allocation4], 3136   ;;  %p2333_p1 = pmov %p2332_p0 }
  0x54   : > { %s1944_s24 = sand.u32 1, %s1717_s15   ;;  %p2334_p11 = scmp.ne.s32.totalorder %s2324_s19, 0 }
  0x55   : > { %1702 = vsyncadd (%p2333_p1), [#allocation4], 4294964160  ;;  %s1468_s30 = sshll.u32 %s1944_s24, 3  ;;  %s177_s23 = scalar_lea.sflag [#allocation7], %s1944_s24 }
  0x56   : > { %s1950_s4 = scalar_lea.vmem [#allocation6], %s1468_s30 }
  0x57   : > { %1704 = dma.done.wait (%p2334_p11), %s177_s23, 128  }
  0x58   : > { %1706 = vsyncadd (%p2334_p11), %s177_s23, 4294967168  ;;  %vm207_vm0 = vcmask 1043456   ;;  %v203_v0 = vld [vmem:[%s1950_s4] sm:$0xff]  ;;  %vm236_vm1 = vcmask 1040384   ;;  %s1731_s19 = smov 50   ;;  %s1732_s21 = smov 51   ;;  %v243_v32 = vlaneseq }
  0x59   : > { %v208_v1 = vsel %vm207_vm0, %v203_v0, 0.0  ;;  %v222_v2 = vsel %vm207_vm0, %v203_v0, -inf  ;;  %v205_v3 = vcombine.high %v203_v0, %v203_v0  ;;  %s1733_s26 = smov 49   ;;  %s1734_s27 = smov 48   ;;  %v1762_v41 = vmov 1983009808  }
  0x5a   : > { %v209_v4 = vrot.slane %v208_v1, 4  ;;  %v223_v5 = vrot.slane %v222_v2, 4  ;;  %s1735_s5 = smov 47   ;;  %s1736_s6 = smov 46   ;;  %v2019_v33 = vand.u32 127, %v243_v32  ;;  %v253_v42 = vunpack.c.l.s4 %v1762_v41 }
  0x5b   : > { %v215_v6 = vsel %vm207_vm0, %v205_v3, 0.0  ;;  %v229_v7 = vsel %vm207_vm0, %v205_v3, -inf  ;;  %s1737_s7 = smov 45   ;;  %s1738_s8 = smov 35   ;;  %v256_v49 = vshrl.u32 %v243_v32, 7 }
  0x5c   : > { %v210_v8 = vadd.f32 %v209_v4, %v208_v1  ;;  %v224_v9 = vmax.f32 %v222_v2, %v223_v5  ;;  %v216_v10 = vrot.slane %v215_v6, 4  ;;  %v230_v11 = vrot.slane %v229_v7, 4  ;;  %s1739_s9 = smov 34   ;;  %s1740_s10 = smov 33   ;;  %v270_v0 = vld [vmem:[#allocation3 + $0x4] sm:$0xf] }
  0x5d   : > { %s1741_s11 = smov 32   ;;  %s1742_s12 = smov 31   ;;  %vm266_vm2 = vcmp.lt.s32.totalorder %v2019_v33, 50  ;;  %vm288_vm3 = vcmp.lt.s32.totalorder %v2019_v33, 49  ;;  %vm310_vm4 = vcmp.lt.s32.totalorder %v2019_v33, 48  ;;  %v254_v48 = vunpack.c.0.s8 %v253_v42 }
  0x5e   : > { %v211_v12 = vrot.slane %v210_v8, 2  ;;  %v225_v13 = vrot.slane %v224_v9, 2  ;;  %v217_v14 = vadd.f32 %v216_v10, %v215_v6  ;;  %v231_v15 = vmax.f32 %v229_v7, %v230_v11  ;;  %s1743_s22 = smov 30   ;;  %s1744_s28 = smov 29   ;;  %v358_v4 = vld [vmem:[#allocation3 + $0x14] sm:$0xf] }
  0x5f   : > { %s1745_s29 = smov 19   ;;  %s1746_s23 = smov 18   ;;  %vm332_vm5 = vcmp.lt.s32.totalorder %v2019_v33, 47  ;;  %v2035_v55 = vsub.s32 %v254_v48, %v256_v49  ;;  %vm354_vm6 = vcmp.lt.s32.totalorder %v2019_v33, 46  ;;  %vm376_vm7 = vcmp.lt.s32.totalorder %v2019_v33, 45 }
  0x60   : > { %v212_v16 = vadd.f32 %v211_v12, %v210_v8  ;;  %v226_v17 = vmax.f32 %v224_v9, %v225_v13  ;;  %v218_v18 = vrot.slane %v217_v14, 2  ;;  %v232_v19 = vrot.slane %v231_v15, 2  ;;  %v292_v11 = vld [vmem:[#allocation3 + $0x8] sm:$0xf] }
  0x61   : > { %vm245_vm8 = vcmp.lt.s32.totalorder %v2019_v33, 51  ;;  %vm398_vm9 = vcmp.lt.s32.totalorder %v2019_v33, 35  ;;  %vm420_vm10 = vcmp.lt.s32.totalorder %v2019_v33, 34  ;;  %vm442_vm11 = vcmp.lt.s32.totalorder %v2019_v33, 33 }
  0x62   : > { %v213_v20 = vrot.slane %v212_v16, 1  ;;  %v227_v21 = vrot.slane %v226_v17, 1  ;;  %v219_v22 = vadd.f32 %v218_v18, %v217_v14  ;;  %v233_v23 = vmax.f32 %v231_v15, %v232_v19 }
  0x63   : > { %vm464_vm12 = vcmp.lt.s32.totalorder %v2019_v33, 32  ;;  %vm486_vm13 = vcmp.lt.s32.totalorder %v2019_v33, 31  ;;  %vm508_vm14 = vcmp.lt.s32.totalorder %v2019_v33, 30  ;;  %vm530_vm15 = vcmp.lt.s32.totalorder %v2019_v33, 29 }
  0x64   : > { %v214_v24 = vadd.f32 %v213_v20, %v212_v16  ;;  %v228_v25 = vmax.f32 %v226_v17, %v227_v21  ;;  %v220_v26 = vrot.slane %v219_v22, 1  ;;  %v234_v27 = vrot.slane %v233_v23, 1  ;;  %v336_v16 = vld [vmem:[#allocation3 + $0x10] sm:$0xf]  ;;  %v380_v20 = vld [vmem:[#allocation3 + $0x18] sm:$0xf] }
  0x65   : > { %v248_v21 = vld [vmem:[#allocation3] sm:$0xf]  ;;  %vm552_vm0 = vcmp.lt.s32.totalorder %v2019_v33, 19 }
  0x66   : > { %v1957_v28 = vsel %vm236_vm1, %v214_v24, %v228_v25  ;;  %v221_v29 = vadd.f32 %v220_v26, %v219_v22  ;;  %v235_v30 = vmax.f32 %v233_v23, %v234_v27 }
  0x67   : > { %262 = vrot.lane.b32.xlu1 %v1957_v28, %s1731_s19  ;;  %239 = vrot.lane.b32.xlu0 %v1957_v28, %s1732_s21 }
  0x68   : > { %v1961_v31 = vsel %vm236_vm1, %v221_v29, %v235_v30  ;;  %vm574_vm1 = vcmp.lt.s32.totalorder %v2019_v33, 18 }
  0x6b   : > { %284 = vrot.lane.b32.xlu0 %v1957_v28, %s1733_s26  ;;  %264 = vrot.lane.b32.xlu1 %v1961_v31, %s1731_s19  ;;  %s1747_s19 = smov 17  }
  0x6f   : > { %306 = vrot.lane.b32.xlu0 %v1957_v28, %s1734_s27  ;;  %286 = vrot.lane.b32.xlu1 %v1961_v31, %s1733_s26  ;;  %s1749_s26 = smov 15  }
  0x73   : > { %328 = vrot.lane.b32.xlu0 %v1957_v28, %s1735_s5  ;;  %308 = vrot.lane.b32.xlu1 %v1961_v31, %s1734_s27  ;;  %s1750_s27 = smov 14  }
  0x77   : > { %350 = vrot.lane.b32.xlu0 %v1957_v28, %s1736_s6  ;;  %330 = vrot.lane.b32.xlu1 %v1961_v31, %s1735_s5  ;;  %s1751_s5 = smov 13  }
  0x7b   : > { %372 = vrot.lane.b32.xlu0 %v1957_v28, %s1737_s7  ;;  %352 = vrot.lane.b32.xlu1 %v1961_v31, %s1736_s6  ;;  %s1752_s6 = smov 3  }
  0x7f   : > { %374 = vrot.lane.b32.xlu1 %v1961_v31, %s1737_s7  ;;  %241 = vrot.lane.b32.xlu0 %v1961_v31, %s1732_s21  ;;  %s1748_s21 = smov 16   ;;  %s1753_s7 = smov 2  }
  0x83   : > { %396 = vrot.lane.b32.xlu1 %v1961_v31, %s1738_s8  ;;  %394 = vrot.lane.b32.xlu0 %v1957_v28, %s1738_s8  ;;  %s1754_s8 = smov 1  }
  0x87   : > { %418 = vrot.lane.b32.xlu1 %v1961_v31, %s1739_s9  ;;  %416 = vrot.lane.b32.xlu0 %v1957_v28, %s1739_s9  ;;  %s1755_s9 = smov 127  }
  0x8b   : > { %440 = vrot.lane.b32.xlu1 %v1961_v31, %s1740_s10  ;;  %438 = vrot.lane.b32.xlu0 %v1957_v28, %s1740_s10  ;;  %s1756_s10 = smov 126  }
  0x8f   : > { %462 = vrot.lane.b32.xlu1 %v1961_v31, %s1741_s11  ;;  %460 = vrot.lane.b32.xlu0 %v1957_v28, %s1741_s11  ;;  %s1757_s11 = smov 125  }
  0x93   : > { %484 = vrot.lane.b32.xlu1 %v1961_v31, %s1742_s12  ;;  %482 = vrot.lane.b32.xlu0 %v1957_v28, %s1742_s12  ;;  %s1758_s12 = smov 115  }
  0x97   : > { %506 = vrot.lane.b32.xlu1 %v1961_v31, %s1743_s22  ;;  %504 = vrot.lane.b32.xlu0 %v1957_v28, %s1743_s22  ;;  %s1759_s22 = smov 114  }
  0x9b   : > { %528 = vrot.lane.b32.xlu1 %v1961_v31, %s1744_s28  ;;  %526 = vrot.lane.b32.xlu0 %v1957_v28, %s1744_s28  ;;  %s1760_s28 = smov 113  }
  0x9f   : > { %550 = vrot.lane.b32.xlu1 %v1961_v31, %s1745_s29  ;;  %548 = vrot.lane.b32.xlu0 %v1957_v28, %s1745_s29  ;;  %s1761_s29 = smov 112  }
  0xa3   : > { %572 = vrot.lane.b32.xlu1 %v1961_v31, %s1746_s23  ;;  %570 = vrot.lane.b32.xlu0 %v1957_v28, %s1746_s23  ;;  %s1763_s23 = smov 111  }
  0xa7   : > { %594 = vrot.lane.b32.xlu1 %v1961_v31, %s1747_s19  ;;  %592 = vrot.lane.b32.xlu0 %v1957_v28, %s1747_s19  ;;  %s1764_s19 = smov 110  }
  0xab   : > { %616 = vrot.lane.b32.xlu1 %v1961_v31, %s1748_s21  ;;  %614 = vrot.lane.b32.xlu0 %v1957_v28, %s1748_s21  ;;  %s1765_s21 = smov 109  }
  0xaf   : > { %638 = vrot.lane.b32.xlu1 %v1961_v31, %s1749_s26  ;;  %636 = vrot.lane.b32.xlu0 %v1957_v28, %s1749_s26  ;;  %s1766_s26 = smov 99  }
  0xb3   : > { %660 = vrot.lane.b32.xlu1 %v1961_v31, %s1750_s27  ;;  %658 = vrot.lane.b32.xlu0 %v1957_v28, %s1750_s27  ;;  %s1767_s27 = smov 98  }
  0xb7   : > { %682 = vrot.lane.b32.xlu1 %v1961_v31, %s1751_s5  ;;  %680 = vrot.lane.b32.xlu0 %v1957_v28, %s1751_s5  ;;  %s1768_s5 = smov 97  }
  0xbb   : > { %704 = vrot.lane.b32.xlu1 %v1961_v31, %s1752_s6  ;;  %702 = vrot.lane.b32.xlu0 %v1957_v28, %s1752_s6  ;;  %s1769_s6 = smov 96  }
  0xbf   : > { %726 = vrot.lane.b32.xlu1 %v1961_v31, %s1753_s7  ;;  %724 = vrot.lane.b32.xlu0 %v1957_v28, %s1753_s7  ;;  %s1770_s7 = smov 95  }
  0xc3   : > { %748 = vrot.lane.b32.xlu1 %v1961_v31, %s1754_s8  ;;  %746 = vrot.lane.b32.xlu0 %v1957_v28, %s1754_s8  ;;  %s1771_s8 = smov 94  }
  0xc7   : > { %785 = vrot.lane.b32.xlu1 %v1961_v31, %s1755_s9  ;;  %783 = vrot.lane.b32.xlu0 %v1957_v28, %s1755_s9  ;;  %s1772_s9 = smov 93  }
  0xcb   : > { %807 = vrot.lane.b32.xlu1 %v1961_v31, %s1756_s10  ;;  %805 = vrot.lane.b32.xlu0 %v1957_v28, %s1756_s10  ;;  %s1773_s10 = smov 83  }
  0xcf   : > { %829 = vrot.lane.b32.xlu1 %v1961_v31, %s1757_s11  ;;  %827 = vrot.lane.b32.xlu0 %v1957_v28, %s1757_s11  ;;  %s1774_s11 = smov 82  }
  0xd3   : > { %851 = vrot.lane.b32.xlu1 %v1961_v31, %s1758_s12  ;;  %849 = vrot.lane.b32.xlu0 %v1957_v28, %s1758_s12  ;;  %s1775_s12 = smov 81  }
  0xd7   : > { %873 = vrot.lane.b32.xlu1 %v1961_v31, %s1759_s22  ;;  %871 = vrot.lane.b32.xlu0 %v1957_v28, %s1759_s22  ;;  %s1776_s22 = smov 80  }
  0xd9   : > { %v263_v34 = vpop.permute.xlu1 %262  ;;  %v2021_v35 = vpop.permute.xlu0 %239 }
  0xdb   : > { %895 = vrot.lane.b32.xlu1 %v1961_v31, %s1760_s28  ;;  %893 = vrot.lane.b32.xlu0 %v1957_v28, %s1760_s28  ;;  %s1777_s28 = smov 79  }
  0xdd   : > { %v285_v36 = vpop.permute.xlu0 %284  ;;  %v265_v37 = vpop.permute.xlu1 %264 }
  0xde   : > { %v267_v38 = vsel %vm266_vm2, %v263_v34, %v265_v37  ;;  %v268_v39 = vsel %vm266_vm2, %v265_v37, %v263_v34  ;;  %vm596_vm2 = vcmp.lt.s32.totalorder %v2019_v33, 17 }
  0xdf   : > { %v273_v40 = vcombine.low %v268_v39, %v267_v38  ;;  %917 = vrot.lane.b32.xlu1 %v1961_v31, %s1761_s29  ;;  %915 = vrot.lane.b32.xlu0 %v1957_v28, %s1761_s29  ;;  %v314_v38 = vld [vmem:[#allocation3 + $0xc] sm:$0xf]  ;;  %v402_v39 = vld [vmem:[#allocation3 + $0x1c] sm:$0xf]  ;;  %s1778_s29 = smov 78  }
  0xe1   : > { %v307_v43 = vpop.permute.xlu0 %306  ;;  %v287_v44 = vpop.permute.xlu1 %286  ;;  %v280_v61 = vrot.slane %v273_v40, %v2035_v55 }
  0xe2   : > { %v289_v45 = vsel %vm288_vm3, %v285_v36, %v287_v44  ;;  %v290_v46 = vsel %vm288_vm3, %v287_v44, %v285_v36  ;;  %vm618_vm3 = vcmp.lt.s32.totalorder %v2019_v33, 16 }
  0xe3   : > { %v295_v47 = vcombine.low %v290_v46, %v289_v45  ;;  %939 = vrot.lane.b32.xlu1 %v1961_v31, %s1763_s23  ;;  %937 = vrot.lane.b32.xlu0 %v1957_v28, %s1763_s23  ;;  %v282_v5 = vmul.f32 %v280_v61, %v270_v0  ;;  %s1779_s23 = smov 77  }
  0xe5   : > { %v329_v50 = vpop.permute.xlu0 %328  ;;  %v309_v51 = vpop.permute.xlu1 %308  ;;  %v302_v6 = vrot.slane %v295_v47, %v2035_v55 }
  0xe6   : > { %v311_v52 = vsel %vm310_vm4, %v307_v43, %v309_v51  ;;  %v312_v53 = vsel %vm310_vm4, %v309_v51, %v307_v43  ;;  %vm640_vm4 = vcmp.lt.s32.totalorder %v2019_v33, 15 }
  0xe7   : > { %v317_v54 = vcombine.low %v312_v53, %v311_v52  ;;  %961 = vrot.lane.b32.xlu1 %v1961_v31, %s1764_s19  ;;  %959 = vrot.lane.b32.xlu0 %v1957_v28, %s1764_s19  ;;  %v304_v22 = vmul.f32 %v302_v6, %v292_v11  ;;  %s1340_s19 = sld [smem:[#allocation2]] }
  0xe9   : > { %v351_v56 = vpop.permute.xlu0 %350  ;;  %v331_v57 = vpop.permute.xlu1 %330  ;;  %v324_v29 = vrot.slane %v317_v54, %v2035_v55 }
  0xea   : > { %v333_v58 = vsel %vm332_vm5, %v329_v50, %v331_v57  ;;  %v334_v59 = vsel %vm332_vm5, %v331_v57, %v329_v50  ;;  %v424_v50 = vld [vmem:[#allocation3 + $0x20] sm:$0xf]  ;;  %vm662_vm5 = vcmp.lt.s32.totalorder %v2019_v33, 14 }
  0xeb   : > { %v339_v60 = vcombine.low %v334_v59, %v333_v58  ;;  %983 = vrot.lane.b32.xlu1 %v1961_v31, %s1765_s21  ;;  %981 = vrot.lane.b32.xlu0 %v1957_v28, %s1765_s21  ;;  %v326_v47 = vmul.f32 %v324_v29, %v314_v38  ;;  %s1478_s21 = sshll.u32 %s1825_s0, 7  ;;  %s1780_s0 = smov [#allocation8]  }
  0xed   : > { %v373_v62 = vpop.permute.xlu0 %372  ;;  %v353_v63 = vpop.permute.xlu1 %352  ;;  %v346_v7 = vrot.slane %v339_v60, %v2035_v55  ;;  %v446_v60 = vld [vmem:[#allocation3 + $0x24] sm:$0xf] }
  0xee   : > { %v355_v1 = vsel %vm354_vm6, %v351_v56, %v353_v63  ;;  %v356_v2 = vsel %vm354_vm6, %v353_v63, %v351_v56  ;;  %vm684_vm6 = vcmp.lt.s32.totalorder %v2019_v33, 13 }
  0xef   : > { %v361_v3 = vcombine.low %v356_v2, %v355_v1  ;;  %1005 = vrot.lane.b32.xlu1 %v1961_v31, %s1766_s26  ;;  %1003 = vrot.lane.b32.xlu0 %v1957_v28, %s1766_s26  ;;  %v348_v30 = vmul.f32 %v346_v7, %v336_v16  ;;  %s202_s26 = scalar_lea.vmem [#allocation8], %s1468_s30  ;;  %s1659_s30 = sshll.u32 %s1780_s0, 4  ;;  %s1660_s30 = int_to_ptr.vmem [resolvable:$false] %s1659_s30 }
  0xf1   : > { %v368_v8 = vrot.slane %v361_v3, %v2035_v55  ;;  %v375_v9 = vpop.permute.xlu1 %374  ;;  %v242_v10 = vpop.permute.xlu0 %241 }
  0xf2   : > { %v377_v12 = vsel %vm376_vm7, %v373_v62, %v375_v9  ;;  %v378_v13 = vsel %vm376_vm7, %v375_v9, %v373_v62  ;;  %v246_v14 = vsel %vm245_vm8, %v2021_v35, %v242_v10  ;;  %v247_v15 = vsel %vm245_vm8, %v242_v10, %v2021_v35 }
  0xf3   : > { %v370_v17 = vmul.f32 %v368_v8, %v358_v4  ;;  %v383_v18 = vcombine.low %v378_v13, %v377_v12  ;;  %v251_v19 = vcombine.low %v247_v15, %v246_v14  ;;  %1027 = vrot.lane.b32.xlu1 %v1961_v31, %s1767_s27  ;;  %1025 = vrot.lane.b32.xlu0 %v1957_v28, %s1767_s27  ;;  %v490_v14 = vld [vmem:[#allocation3 + $0x2c] sm:$0xf]  ;;  %vm706_vm7 = vcmp.lt.s32.totalorder %v2019_v33, 3  ;;  %s1377_s27 = sshll.u32 %s202_s26, 4  ;;  %s2275_s27 = int_to_ptr.vmem [resolvable:$true] %s1377_s27 }
  0xf4   : > { %vm728_vm8 = vcmp.lt.s32.totalorder %v2019_v33, 2  ;;  %p1662_p10 = scmp.lt.s32.totalorder %s2275_s27, %s1660_s30 }
  0xf5   : > { %v371_v23 = vadd.f32 %v370_v17, %v282_v5  ;;  %v390_v24 = vrot.slane %v383_v18, %v2035_v55  ;;  %v258_v25 = vrot.slane %v251_v19, %v2035_v55  ;;  %v397_v26 = vpop.permute.xlu1 %396  ;;  %v395_v27 = vpop.permute.xlu0 %394  ;;  %v468_v5 = vld [vmem:[#allocation3 + $0x28] sm:$0xf] }
  0xf6   : > { %v399_v32 = vsel %vm398_vm9, %v395_v27, %v397_v26  ;;  %v400_v34 = vsel %vm398_vm9, %v397_v26, %v395_v27  ;;  %vm750_vm9 = vcmp.lt.s32.totalorder %v2019_v33, 1 }
  0xf7   : > { %v392_v35 = vmul.f32 %v390_v24, %v380_v20  ;;  %v260_v36 = vmul.f32 %v258_v25, %v248_v21  ;;  %v405_v37 = vcombine.low %v400_v34, %v399_v32  ;;  %1049 = vrot.lane.b32.xlu1 %v1961_v31, %s1768_s5  ;;  %1047 = vrot.lane.b32.xlu0 %v1957_v28, %s1768_s5 }
  0xf9   : > { %v393_v40 = vadd.f32 %v392_v35, %v304_v22  ;;  %v349_v41 = vadd.f32 %v348_v30, %v260_v36  ;;  %v412_v42 = vrot.slane %v405_v37, %v2035_v55  ;;  %v419_v43 = vpop.permute.xlu1 %418  ;;  %v417_v44 = vpop.permute.xlu0 %416  ;;  %v534_v35 = vld [vmem:[#allocation3 + $0x34] sm:$0xf] }
  0xfa   : > { %v421_v45 = vsel %vm420_vm10, %v417_v44, %v419_v43  ;;  %v422_v46 = vsel %vm420_vm10, %v419_v43, %v417_v44  ;;  %v556_v44 = vld [vmem:[#allocation3 + $0x38] sm:$0xf]  ;;  %vm787_vm10 = vcmp.lt.s32.totalorder %v2019_v33, 127 }
  0xfb   : > { %v414_v48 = vmul.f32 %v412_v42, %v402_v39  ;;  %v427_v49 = vcombine.low %v422_v46, %v421_v45  ;;  %1071 = vrot.lane.b32.xlu1 %v1961_v31, %s1769_s6  ;;  %1069 = vrot.lane.b32.xlu0 %v1957_v28, %s1769_s6 }
  0xfd   : > { %v415_v51 = vadd.f32 %v414_v48, %v326_v47  ;;  %v434_v52 = vrot.slane %v427_v49, %v2035_v55  ;;  %v441_v53 = vpop.permute.xlu1 %440  ;;  %v439_v54 = vpop.permute.xlu0 %438 }
  0xfe   : > { %v443_v56 = vsel %vm442_vm11, %v439_v54, %v441_v53  ;;  %v444_v57 = vsel %vm442_vm11, %v441_v53, %v439_v54  ;;  %v578_v53 = vld [vmem:[#allocation3 + $0x3c] sm:$0xf]  ;;  %vm809_vm11 = vcmp.lt.s32.totalorder %v2019_v33, 126 }
  0xff   : > { %v436_v58 = vmul.f32 %v434_v52, %v424_v50  ;;  %v449_v59 = vcombine.low %v444_v57, %v443_v56  ;;  %1093 = vrot.lane.b32.xlu1 %v1961_v31, %s1770_s7  ;;  %1091 = vrot.lane.b32.xlu0 %v1957_v28, %s1770_s7  ;;  %s2273_s7 = scalar_lea.hbm %s2320_s3, %s1478_s21 }
 0x101   : > { %v437_v61 = vadd.f32 %v436_v58, %v349_v41  ;;  %v456_v62 = vrot.slane %v449_v59, %v2035_v55  ;;  %v463_v63 = vpop.permute.xlu1 %462  ;;  %v461_v0 = vpop.permute.xlu0 %460 }
 0x102   : > { %v465_v1 = vsel %vm464_vm12, %v461_v0, %v463_v63  ;;  %v466_v2 = vsel %vm464_vm12, %v463_v63, %v461_v0  ;;  %v600_v63 = vld [vmem:[#allocation3 + $0x40] sm:$0xf]  ;;  %vm831_vm12 = vcmp.lt.s32.totalorder %v2019_v33, 125 }
 0x103   : > { %v458_v3 = vmul.f32 %v456_v62, %v446_v60  ;;  %v471_v4 = vcombine.low %v466_v2, %v465_v1  ;;  %1115 = vrot.lane.b32.xlu1 %v1961_v31, %s1771_s8  ;;  %1113 = vrot.lane.b32.xlu0 %v1957_v28, %s1771_s8  ;;  %s1363_s8 = scalar_lea.sflag [#allocation5], %s1944_s24 }
 0x105   : > { %v459_v6 = vadd.f32 %v458_v3, %v371_v23  ;;  %v478_v7 = vrot.slane %v471_v4, %v2035_v55  ;;  %v485_v8 = vpop.permute.xlu1 %484  ;;  %v483_v9 = vpop.permute.xlu0 %482  ;;  %v512_v23 = vld [vmem:[#allocation3 + $0x30] sm:$0xf] }
 0x106   : > { %v487_v10 = vsel %vm486_vm13, %v483_v9, %v485_v8  ;;  %v488_v11 = vsel %vm486_vm13, %v485_v8, %v483_v9  ;;  %v622_v8 = vld [vmem:[#allocation3 + $0x44] sm:$0xf]  ;;  %vm853_vm13 = vcmp.lt.s32.totalorder %v2019_v33, 115 }
 0x107   : > { %v480_v12 = vmul.f32 %v478_v7, %v468_v5  ;;  %v493_v13 = vcombine.low %v488_v11, %v487_v10  ;;  %1137 = vrot.lane.b32.xlu1 %v1961_v31, %s1772_s9  ;;  %1135 = vrot.lane.b32.xlu0 %v1957_v28, %s1772_s9  ;;  %s1655_s9 = scalar_lea.vmem %s2275_s27, 128 }
 0x108   : > { %p1656_p4 = scmp.ne.s32.totalorder %s2275_s27, %s1655_s9 }
 0x109   : > { %v481_v15 = vadd.f32 %v480_v12, %v393_v40  ;;  %v500_v16 = vrot.slane %v493_v13, %v2035_v55  ;;  %v507_v17 = vpop.permute.xlu1 %506  ;;  %v505_v18 = vpop.permute.xlu0 %504 }
 0x10a   : > { %v509_v19 = vsel %vm508_vm14, %v505_v18, %v507_v17  ;;  %v510_v20 = vsel %vm508_vm14, %v507_v17, %v505_v18  ;;  %v644_v17 = vld [vmem:[#allocation3 + $0x48] sm:$0xf]  ;;  %vm875_vm14 = vcmp.lt.s32.totalorder %v2019_v33, 114  ;;  %p1657_p6 = pnand %p1656_p4, %p1895_p12 }
 0x10b   : > { %v502_v21 = vmul.f32 %v500_v16, %v490_v14  ;;  %v515_v22 = vcombine.low %v510_v20, %v509_v19  ;;  %1159 = vrot.lane.b32.xlu1 %v1961_v31, %s1773_s10  ;;  %1157 = vrot.lane.b32.xlu0 %v1957_v28, %s1773_s10 }
 0x10c   : > { %p1658_p8 = pneg %p1657_p6 }
 0x10d   : > { %v503_v24 = vadd.f32 %v502_v21, %v415_v51  ;;  %v522_v25 = vrot.slane %v515_v22, %v2035_v55  ;;  %v529_v26 = vpop.permute.xlu1 %528  ;;  %v527_v27 = vpop.permute.xlu0 %526 }
 0x10e   : > { %v531_v29 = vsel %vm530_vm15, %v527_v27, %v529_v26  ;;  %v532_v30 = vsel %vm530_vm15, %v529_v26, %v527_v27  ;;  %v666_v26 = vld [vmem:[#allocation3 + $0x4c] sm:$0xf]  ;;  %vm897_vm15 = vcmp.lt.s32.totalorder %v2019_v33, 113 }
 0x10f   : > { %v524_v32 = vmul.f32 %v522_v25, %v512_v23  ;;  %v537_v34 = vcombine.low %v532_v30, %v531_v29  ;;  %1181 = vrot.lane.b32.xlu1 %v1961_v31, %s1774_s11  ;;  %1179 = vrot.lane.b32.xlu0 %v1957_v28, %s1774_s11 }
 0x111   : > { %v525_v36 = vadd.f32 %v524_v32, %v437_v61  ;;  %v544_v37 = vrot.slane %v537_v34, %v2035_v55  ;;  %v551_v38 = vpop.permute.xlu1 %550  ;;  %v549_v39 = vpop.permute.xlu0 %548 }
 0x112   : > { %v553_v40 = vsel %vm552_vm0, %v549_v39, %v551_v38  ;;  %v554_v41 = vsel %vm552_vm0, %v551_v38, %v549_v39  ;;  %v688_v38 = vld [vmem:[#allocation3 + $0x50] sm:$0xf]  ;;  %vm919_vm0 = vcmp.lt.s32.totalorder %v2019_v33, 112 }
 0x113   : > { %v546_v42 = vmul.f32 %v544_v37, %v534_v35  ;;  %v559_v43 = vcombine.low %v554_v41, %v553_v40  ;;  %1203 = vrot.lane.b32.xlu1 %v1961_v31, %s1775_s12  ;;  %1201 = vrot.lane.b32.xlu0 %v1957_v28, %s1775_s12 }
 0x115   : > { %v547_v45 = vadd.f32 %v546_v42, %v459_v6  ;;  %v566_v46 = vrot.slane %v559_v43, %v2035_v55  ;;  %v573_v47 = vpop.permute.xlu1 %572  ;;  %v571_v48 = vpop.permute.xlu0 %570 }
 0x116   : > { %v575_v49 = vsel %vm574_vm1, %v571_v48, %v573_v47  ;;  %v576_v50 = vsel %vm574_vm1, %v573_v47, %v571_v48  ;;  %v710_v47 = vld [vmem:[#allocation3 + $0x54] sm:$0xf]  ;;  %vm941_vm1 = vcmp.lt.s32.totalorder %v2019_v33, 111 }
 0x117   : > { %v568_v51 = vmul.f32 %v566_v46, %v556_v44  ;;  %v581_v52 = vcombine.low %v576_v50, %v575_v49  ;;  %1225 = vrot.lane.b32.xlu1 %v1961_v31, %s1776_s22  ;;  %1223 = vrot.lane.b32.xlu0 %v1957_v28, %s1776_s22 }
 0x119   : > { %v569_v54 = vadd.f32 %v568_v51, %v481_v15  ;;  %v588_v56 = vrot.slane %v581_v52, %v2035_v55  ;;  %v595_v57 = vpop.permute.xlu1 %594  ;;  %v593_v58 = vpop.permute.xlu0 %592 }
 0x11a   : > { %v597_v59 = vsel %vm596_vm2, %v593_v58, %v595_v57  ;;  %v598_v60 = vsel %vm596_vm2, %v595_v57, %v593_v58  ;;  %v732_v57 = vld [vmem:[#allocation3 + $0x58] sm:$0xf]  ;;  %vm963_vm2 = vcmp.lt.s32.totalorder %v2019_v33, 110 }
 0x11b   : > { %v590_v61 = vmul.f32 %v588_v56, %v578_v53  ;;  %v603_v62 = vcombine.low %v598_v60, %v597_v59  ;;  %1247 = vrot.lane.b32.xlu1 %v1961_v31, %s1777_s28  ;;  %1245 = vrot.lane.b32.xlu0 %v1957_v28, %s1777_s28 }
 0x11d   : > { %v591_v0 = vadd.f32 %v590_v61, %v503_v24  ;;  %v610_v1 = vrot.slane %v603_v62, %v2035_v55  ;;  %v617_v2 = vpop.permute.xlu1 %616  ;;  %v615_v3 = vpop.permute.xlu0 %614 }
 0x11e   : > { %v619_v4 = vsel %vm618_vm3, %v615_v3, %v617_v2  ;;  %v620_v5 = vsel %vm618_vm3, %v617_v2, %v615_v3  ;;  %v754_v2 = vld [vmem:[#allocation3 + $0x5c] sm:$0xf]  ;;  %vm985_vm3 = vcmp.lt.s32.totalorder %v2019_v33, 109 }
 0x11f   : > { %v612_v6 = vmul.f32 %v610_v1, %v600_v63  ;;  %v625_v7 = vcombine.low %v620_v5, %v619_v4  ;;  %1269 = vrot.lane.b32.xlu1 %v1961_v31, %s1778_s29  ;;  %1267 = vrot.lane.b32.xlu0 %v1957_v28, %s1778_s29 }
 0x121   : > { %v613_v9 = vadd.f32 %v612_v6, %v525_v36  ;;  %v632_v10 = vrot.slane %v625_v7, %v2035_v55  ;;  %v639_v11 = vpop.permute.xlu1 %638  ;;  %v637_v12 = vpop.permute.xlu0 %636 }
 0x122   : > { %v641_v13 = vsel %vm640_vm4, %v637_v12, %v639_v11  ;;  %v642_v14 = vsel %vm640_vm4, %v639_v11, %v637_v12  ;;  %v791_v11 = vld [vmem:[#allocation3 + $0x64] sm:$0xf]  ;;  %vm1007_vm4 = vcmp.lt.s32.totalorder %v2019_v33, 99 }
 0x123   : > { %v634_v15 = vmul.f32 %v632_v10, %v622_v8  ;;  %v647_v16 = vcombine.low %v642_v14, %v641_v13  ;;  %1291 = vrot.lane.b32.xlu1 %v1961_v31, %s1779_s23  ;;  %1289 = vrot.lane.b32.xlu0 %v1957_v28, %s1779_s23 }
 0x125   : > { %v635_v18 = vadd.f32 %v634_v15, %v547_v45  ;;  %v654_v19 = vrot.slane %v647_v16, %v2035_v55  ;;  %v661_v20 = vpop.permute.xlu1 %660  ;;  %v659_v21 = vpop.permute.xlu0 %658 }
 0x126   : > { %v663_v22 = vsel %vm662_vm5, %v659_v21, %v661_v20  ;;  %v664_v23 = vsel %vm662_vm5, %v661_v20, %v659_v21  ;;  %v772_v20 = vcombine.low %v1957_v28, %v1961_v31  ;;  %v813_v21 = vld [vmem:[#allocation3 + $0x68] sm:$0xf]  ;;  %vm1029_vm5 = vcmp.lt.s32.totalorder %v2019_v33, 98 }
 0x127   : > { %v656_v24 = vmul.f32 %v654_v19, %v644_v17  ;;  %v669_v25 = vcombine.low %v664_v23, %v663_v22 }
 0x129   : > { %v657_v27 = vadd.f32 %v656_v24, %v569_v54  ;;  %v676_v29 = vrot.slane %v669_v25, %v2035_v55  ;;  %v683_v30 = vpop.permute.xlu1 %682  ;;  %v681_v32 = vpop.permute.xlu0 %680 }
 0x12a   : > { %v685_v34 = vsel %vm684_vm6, %v681_v32, %v683_v30  ;;  %v686_v35 = vsel %vm684_vm6, %v683_v30, %v681_v32  ;;  %v779_v32 = vrot.slane %v772_v20, %v2035_v55  ;;  %vm1051_vm6 = vcmp.lt.s32.totalorder %v2019_v33, 97 }
 0x12b   : > { %v678_v36 = vmul.f32 %v676_v29, %v666_v26  ;;  %v691_v37 = vcombine.low %v686_v35, %v685_v34  ;;  %v835_v34 = vld [vmem:[#allocation3 + $0x6c] sm:$0xf]  ;;  %v769_v35 = vld [vmem:[#allocation3 + $0x60] sm:$0xf] }
 0x12d   : > { %v679_v39 = vadd.f32 %v678_v36, %v591_v0  ;;  %v698_v40 = vrot.slane %v691_v37, %v2035_v55  ;;  %v705_v41 = vpop.permute.xlu1 %704  ;;  %v703_v42 = vpop.permute.xlu0 %702 }
 0x12e   : > { %v707_v43 = vsel %vm706_vm7, %v703_v42, %v705_v41  ;;  %v708_v44 = vsel %vm706_vm7, %v705_v41, %v703_v42  ;;  %v781_v41 = vmul.f32 %v779_v32, %v769_v35  ;;  %vm1073_vm7 = vcmp.lt.s32.totalorder %v2019_v33, 96 }
 0x12f   : > { %v700_v45 = vmul.f32 %v698_v40, %v688_v38  ;;  %v713_v46 = vcombine.low %v708_v44, %v707_v43  ;;  %v857_v43 = vld [vmem:[#allocation3 + $0x70] sm:$0xf] }
 0x131   : > { %v2109_v48 = vadd.f32 %v700_v45, %v613_v9  ;;  %v720_v49 = vrot.slane %v713_v46, %v2035_v55  ;;  %v727_v50 = vpop.permute.xlu1 %726  ;;  %v725_v51 = vpop.permute.xlu0 %724 }
 0x132   : > { %v729_v52 = vsel %vm728_vm8, %v725_v51, %v727_v50  ;;  %v730_v53 = vsel %vm728_vm8, %v727_v50, %v725_v51  ;;  %vm1095_vm8 = vcmp.lt.s32.totalorder %v2019_v33, 95 }
 0x133   : > { %v722_v54 = vmul.f32 %v720_v49, %v710_v47  ;;  %v735_v56 = vcombine.low %v730_v53, %v729_v52  ;;  %v782_v51 = vadd.f32 %v781_v41, %v2109_v48 }
 0x135   : > { %v723_v58 = vadd.f32 %v722_v54, %v635_v18  ;;  %v742_v59 = vrot.slane %v735_v56, %v2035_v55  ;;  %v749_v60 = vpop.permute.xlu1 %748  ;;  %v747_v61 = vpop.permute.xlu0 %746  ;;  %v879_v54 = vld [vmem:[#allocation3 + $0x74] sm:$0xf] }
 0x136   : > { %v751_v62 = vsel %vm750_vm9, %v747_v61, %v749_v60  ;;  %v752_v63 = vsel %vm750_vm9, %v749_v60, %v747_v61  ;;  %vm1117_vm9 = vcmp.lt.s32.totalorder %v2019_v33, 94 }
 0x137   : > { %v744_v0 = vmul.f32 %v742_v59, %v732_v57  ;;  %v757_v1 = vcombine.low %v752_v63, %v751_v62 }
 0x139   : > { %v745_v3 = vadd.f32 %v744_v0, %v657_v27  ;;  %v764_v4 = vrot.slane %v757_v1, %v2035_v55  ;;  %v786_v5 = vpop.permute.xlu1 %785  ;;  %v784_v6 = vpop.permute.xlu0 %783  ;;  %v901_v0 = vld [vmem:[#allocation3 + $0x78] sm:$0xf] }
 0x13a   : > { %v788_v7 = vsel %vm787_vm10, %v784_v6, %v786_v5  ;;  %v789_v8 = vsel %vm787_vm10, %v786_v5, %v784_v6  ;;  %vm1139_vm10 = vcmp.lt.s32.totalorder %v2019_v33, 93 }
 0x13b   : > { %v766_v9 = vmul.f32 %v764_v4, %v754_v2  ;;  %v794_v10 = vcombine.low %v788_v7, %v789_v8 }
 0x13d   : > { %v767_v12 = vadd.f32 %v766_v9, %v679_v39  ;;  %v801_v13 = vrot.slane %v794_v10, %v2035_v55  ;;  %v808_v14 = vpop.permute.xlu1 %807  ;;  %v806_v15 = vpop.permute.xlu0 %805 }
 0x13e   : > { %v810_v16 = vsel %vm809_vm11, %v806_v15, %v808_v14  ;;  %v811_v17 = vsel %vm809_vm11, %v808_v14, %v806_v15  ;;  %vm1161_vm11 = vcmp.lt.s32.totalorder %v2019_v33, 83 }
 0x13f   : > { %v803_v18 = vmul.f32 %v801_v13, %v791_v11  ;;  %v816_v19 = vcombine.low %v810_v16, %v811_v17 }
 0x141   : > { %v804_v22 = vadd.f32 %v803_v18, %v723_v58  ;;  %v823_v23 = vrot.slane %v816_v19, %v2035_v55  ;;  %v830_v24 = vpop.permute.xlu1 %829  ;;  %v828_v25 = vpop.permute.xlu0 %827 }
 0x142   : > { %v832_v26 = vsel %vm831_vm12, %v828_v25, %v830_v24  ;;  %v833_v27 = vsel %vm831_vm12, %v830_v24, %v828_v25  ;;  %vm1183_vm12 = vcmp.lt.s32.totalorder %v2019_v33, 82 }
 0x143   : > { %v825_v29 = vmul.f32 %v823_v23, %v813_v21  ;;  %v838_v30 = vcombine.low %v832_v26, %v833_v27 }
 0x145   : > { %v826_v36 = vadd.f32 %v825_v29, %v745_v3  ;;  %v845_v37 = vrot.slane %v838_v30, %v2035_v55  ;;  %v852_v28 = vpop.permute.xlu1 %851  ;;  %v850_v31 = vpop.permute.xlu0 %849 }
 0x146   : > { %v854_v38 = vsel %vm853_vm13, %v850_v31, %v852_v28  ;;  %v855_v39 = vsel %vm853_vm13, %v852_v28, %v850_v31  ;;  %vm1205_vm13 = vcmp.lt.s32.totalorder %v2019_v33, 81 }
 0x147   : > { %v847_v40 = vmul.f32 %v845_v37, %v835_v34  ;;  %v860_v42 = vcombine.low %v854_v38, %v855_v39  ;;  %v923_v37 = vld [vmem:[#allocation3 + $0x7c] sm:$0xf] }
 0x149   : > { %v2126_v44 = vadd.f32 %v847_v40, %v767_v12  ;;  %v867_v45 = vrot.slane %v860_v42, %v2035_v55  ;;  %v874_v46 = vpop.permute.xlu1 %873  ;;  %v872_v47 = vpop.permute.xlu0 %871 }
 0x14a   : > { %v876_v49 = vsel %vm875_vm14, %v872_v47, %v874_v46  ;;  %v877_v50 = vsel %vm875_vm14, %v874_v46, %v872_v47  ;;  %vm1227_vm14 = vcmp.lt.s32.totalorder %v2019_v33, 80 }
 0x14b   : > { %v869_v52 = vmul.f32 %v867_v45, %v857_v43  ;;  %v882_v53 = vcombine.low %v876_v49, %v877_v50  ;;  %v945_v43 = vld [vmem:[#allocation3 + $0x80] sm:$0xf]  ;;  %v967_v50 = vld [vmem:[#allocation3 + $0x84] sm:$0xf] }
 0x14d   : > { %v2131_v56 = vadd.f32 %v869_v52, %v782_v51  ;;  %v889_v57 = vrot.slane %v882_v53, %v2035_v55  ;;  %v896_v58 = vpop.permute.xlu1 %895  ;;  %v894_v59 = vpop.permute.xlu0 %893 }
 0x14e   : > { %v898_v60 = vsel %vm897_vm15, %v894_v59, %v896_v58  ;;  %v899_v61 = vsel %vm897_vm15, %v896_v58, %v894_v59  ;;  %vm1249_vm15 = vcmp.lt.s32.totalorder %v2019_v33, 79 }
 0x14f   : > { %v891_v62 = vmul.f32 %v889_v57, %v879_v54  ;;  %v904_v63 = vcombine.low %v898_v60, %v899_v61 }
 0x151   : > { %v2134_v1 = vadd.f32 %v891_v62, %v804_v22  ;;  %v911_v48 = vrot.slane %v904_v63, %v2035_v55  ;;  %v918_v2 = vpop.permute.xlu1 %917  ;;  %v916_v3 = vpop.permute.xlu0 %915 }
 0x152   : > { %v920_v22 = vsel %vm919_vm0, %v916_v3, %v918_v2  ;;  %v921_v23 = vsel %vm919_vm0, %v918_v2, %v916_v3  ;;  %vm1271_vm0 = vcmp.lt.s32.totalorder %v2019_v33, 78 }
 0x153   : > { %v913_v4 = vmul.f32 %v911_v48, %v901_v0  ;;  %v926_v26 = vcombine.low %v920_v22, %v921_v23 }
 0x155   : > { %v2137_v5 = vadd.f32 %v913_v4, %v826_v36  ;;  %v940_v6 = vpop.permute.xlu1 %939  ;;  %v938_v7 = vpop.permute.xlu0 %937  ;;  %v933_v36 = vrot.slane %v926_v26, %v2035_v55 }
 0x156   : > { %v942_v30 = vsel %vm941_vm1, %v938_v7, %v940_v6  ;;  %v943_v32 = vsel %vm941_vm1, %v940_v6, %v938_v7  ;;  %vm1293_vm1 = vcmp.lt.s32.totalorder %v2019_v33, 77 }
 0x157   : > { %v948_v28 = vcombine.low %v942_v30, %v943_v32  ;;  %v935_v40 = vmul.f32 %v933_v36, %v923_v37 }
 0x159   : > { %v962_v8 = vpop.permute.xlu1 %961  ;;  %v960_v9 = vpop.permute.xlu0 %959  ;;  %v955_v45 = vrot.slane %v948_v28, %v2035_v55  ;;  %v2169_v51 = vadd.f32 %v935_v40, %v2126_v44  ;;  %v1099_v40 = vld [vmem:[#allocation3 + $0x9c] sm:$0xf] }
 0x15a   : > { %v964_v34 = vsel %vm963_vm2, %v960_v9, %v962_v8  ;;  %v965_v35 = vsel %vm963_vm2, %v962_v8, %v960_v9  ;;  %vm1325_vm2 = vcmask 1041408  }
 0x15b   : > { %v970_v31 = vcombine.low %v964_v34, %v965_v35  ;;  %v957_v59 = vmul.f32 %v955_v45, %v945_v43 }
 0x15d   : > { %v984_v10 = vpop.permute.xlu1 %983  ;;  %v982_v11 = vpop.permute.xlu0 %981  ;;  %v977_v46 = vrot.slane %v970_v31, %v2035_v55 }
 0x15e   : > { %v986_v41 = vsel %vm985_vm3, %v982_v11, %v984_v10  ;;  %v987_v42 = vsel %vm985_vm3, %v984_v10, %v982_v11 }
 0x15f   : > { %v992_v52 = vcombine.low %v986_v41, %v987_v42  ;;  %v979_v44 = vmul.f32 %v977_v46, %v967_v50 }
 0x161   : > { %v1006_v12 = vpop.permute.xlu1 %1005  ;;  %v1004_v13 = vpop.permute.xlu0 %1003  ;;  %v999_v4 = vrot.slane %v992_v52, %v2035_v55 }
 0x162   : > { %v1008_v53 = vsel %vm1007_vm4, %v1004_v13, %v1006_v12  ;;  %v1009_v54 = vsel %vm1007_vm4, %v1006_v12, %v1004_v13 }
 0x163   : > { %v1014_v6 = vcombine.low %v1008_v53, %v1009_v54 }
 0x165   : > { %v1028_v14 = vpop.permute.xlu1 %1027  ;;  %v1026_v15 = vpop.permute.xlu0 %1025 }
 0x166   : > { %v1030_v57 = vsel %vm1029_vm5, %v1026_v15, %v1028_v14  ;;  %v1031_v58 = vsel %vm1029_vm5, %v1028_v14, %v1026_v15 }
 0x167   : > { %v1036_v7 = vcombine.low %v1030_v57, %v1031_v58 }
 0x169   : > { %v2139_v16 = vpop.permute.xlu1 %1049  ;;  %v2141_v17 = vpop.permute.xlu0 %1047 }
 0x16a   : > { %v1052_v8 = vsel %vm1051_vm6, %v2141_v17, %v2139_v16  ;;  %v1053_v9 = vsel %vm1051_vm6, %v2139_v16, %v2141_v17 }
 0x16b   : > { %v1058_v26 = vcombine.low %v1052_v8, %v1053_v9  ;;  %v1143_v9 = vld [vmem:[#allocation3 + $0xa4] sm:$0xf] }
 0x16d   : > { %v1072_v18 = vpop.permute.xlu1 %1071  ;;  %v1070_v19 = vpop.permute.xlu0 %1069  ;;  %v1065_v54 = vrot.slane %v1058_v26, %v2035_v55 }
 0x16e   : > { %v1074_v60 = vsel %vm1073_vm7, %v1070_v19, %v1072_v18  ;;  %v1075_v61 = vsel %vm1073_vm7, %v1072_v18, %v1070_v19  ;;  %v958_v19 = vadd.f32 %v957_v59, %v2131_v56  ;;  %v1187_v59 = vld [vmem:[#allocation3 + $0xac] sm:$0xf] }
 0x16f   : > { %v1080_v10 = vcombine.low %v1074_v60, %v1075_v61  ;;  %v1055_v60 = vld [vmem:[#allocation3 + $0x94] sm:$0xf] }
 0x171   : > { %v1094_v20 = vpop.permute.xlu1 %1093  ;;  %v1092_v21 = vpop.permute.xlu0 %1091  ;;  %v1087_v30 = vrot.slane %v1080_v10, %v2035_v55 }
 0x172   : > { %v1096_v0 = vsel %vm1095_vm8, %v1092_v21, %v1094_v20  ;;  %v1097_v48 = vsel %vm1095_vm8, %v1094_v20, %v1092_v21  ;;  %v2217_v20 = vadd.f32 %v979_v44, %v2134_v1  ;;  %v989_v21 = vld [vmem:[#allocation3 + $0x88] sm:$0xf]  ;;  %v1011_v1 = vld [vmem:[#allocation3 + $0x8c] sm:$0xf] }
 0x173   : > { %v1102_v13 = vcombine.low %v1096_v0, %v1097_v48  ;;  %v1001_v36 = vmul.f32 %v999_v4, %v989_v21 }
 0x175   : > { %v2144_v24 = vpop.permute.xlu1 %1115  ;;  %v2146_v25 = vpop.permute.xlu0 %1113  ;;  %v1109_v37 = vrot.slane %v1102_v13, %v2035_v55  ;;  %v1002_v44 = vadd.f32 %v1001_v36, %v2137_v5 }
 0x176   : > { %v1118_v14 = vsel %vm1117_vm9, %v2146_v25, %v2144_v24  ;;  %v1119_v15 = vsel %vm1117_vm9, %v2144_v24, %v2146_v25  ;;  %v1021_v24 = vrot.slane %v1014_v6, %v2035_v55  ;;  %v1043_v25 = vrot.slane %v1036_v7, %v2035_v55  ;;  %v1253_v6 = vld [vmem:[#allocation3 + $0xb8] sm:$0xf] }
 0x177   : > { %v1124_v32 = vcombine.low %v1118_v14, %v1119_v15  ;;  %v1111_v61 = vmul.f32 %v1109_v37, %v1099_v40  ;;  %v1067_v14 = vmul.f32 %v1065_v54, %v1055_v60  ;;  %v1297_v37 = vld [vmem:[#allocation3 + $0xc0] sm:$0xf] }
 0x178   : > { %v1023_v46 = vmul.f32 %v1021_v24, %v1011_v1  ;;  %v1231_v1 = vld [vmem:[#allocation3 + $0xb4] sm:$0xf] }
 0x179   : > { %v2150_v27 = vpop.permute.xlu1 %1137  ;;  %v2152_v29 = vpop.permute.xlu0 %1135  ;;  %v1131_v58 = vrot.slane %v1124_v32, %v2035_v55 }
 0x17a   : > { %v1140_v22 = vsel %vm1139_vm10, %v2152_v29, %v2150_v27  ;;  %v1141_v23 = vsel %vm1139_vm10, %v2150_v27, %v2152_v29  ;;  %v1033_v27 = vld [vmem:[#allocation3 + $0x90] sm:$0xf]  ;;  %v1077_v29 = vld [vmem:[#allocation3 + $0x98] sm:$0xf]  ;;  %v1024_v5 = vadd.f32 %v1023_v46, %v2169_v51 }
 0x17b   : > { %v1146_v28 = vcombine.low %v1140_v22, %v1141_v23  ;;  %v1045_v53 = vmul.f32 %v1043_v25, %v1033_v27  ;;  %v1089_v57 = vmul.f32 %v1087_v30, %v1077_v29  ;;  %v1068_v27 = vadd.f32 %v1067_v14, %v2217_v20 }
 0x17c   : > { %v1112_v21 = vadd.f32 %v1111_v61, %v1024_v5 }
 0x17d   : > { %v1160_v38 = vpop.permute.xlu1 %1159  ;;  %v1158_v39 = vpop.permute.xlu0 %1157  ;;  %v1046_v13 = vadd.f32 %v1045_v53, %v958_v19  ;;  %v1090_v15 = vadd.f32 %v1089_v57, %v1002_v44 }
 0x17e   : > { %v1162_v2 = vsel %vm1161_vm11, %v1158_v39, %v1160_v38  ;;  %v1163_v3 = vsel %vm1161_vm11, %v1160_v38, %v1158_v39 }
 0x17f   : > { %v1168_v18 = vcombine.low %v1162_v2, %v1163_v3  ;;  %v1153_v3 = vrot.slane %v1146_v28, %v2035_v55 }
 0x181   : > { %v1182_v47 = vpop.permute.xlu1 %1181  ;;  %v1180_v49 = vpop.permute.xlu0 %1179  ;;  %v1175_v31 = vrot.slane %v1168_v18, %v2035_v55  ;;  %v1155_v51 = vmul.f32 %v1153_v3, %v1143_v9 }
 0x182   : > { %v1184_v11 = vsel %vm1183_vm12, %v1180_v49, %v1182_v47  ;;  %v1185_v12 = vsel %vm1183_vm12, %v1182_v47, %v1180_v49  ;;  %v1165_v47 = vld [vmem:[#allocation3 + $0xa8] sm:$0xf] }
 0x183   : > { %v1190_v56 = vcombine.low %v1184_v11, %v1185_v12  ;;  %v1177_v4 = vmul.f32 %v1175_v31, %v1165_v47  ;;  %v1156_v40 = vadd.f32 %v1155_v51, %v1068_v27 }
 0x185   : > { %v1204_v62 = vpop.permute.xlu1 %1203  ;;  %v1202_v63 = vpop.permute.xlu0 %1201  ;;  %v1197_v49 = vrot.slane %v1190_v56, %v2035_v55  ;;  %v1178_v56 = vadd.f32 %v1177_v4, %v1090_v15 }
 0x186   : > { %v1206_v34 = vsel %vm1205_vm13, %v1202_v63, %v1204_v62  ;;  %v1207_v35 = vsel %vm1205_vm13, %v1204_v62, %v1202_v63  ;;  %v1121_v62 = vld [vmem:[#allocation3 + $0xa0] sm:$0xf] }
 0x187   : > { %v1212_v50 = vcombine.low %v1206_v34, %v1207_v35  ;;  %v1199_v10 = vmul.f32 %v1197_v49, %v1187_v59  ;;  %v1133_v18 = vmul.f32 %v1131_v58, %v1121_v62 }
 0x189   : > { %v1226_v16 = vpop.permute.xlu1 %1225  ;;  %v1224_v17 = vpop.permute.xlu0 %1223  ;;  %v1219_v11 = vrot.slane %v1212_v50, %v2035_v55  ;;  %v1200_v32 = vadd.f32 %v1199_v10, %v1112_v21  ;;  %v1134_v29 = vadd.f32 %v1133_v18, %v1046_v13  ;;  %v1596_v13 = vld [vmem:[%s1950_s4] sm:$0xff]  ;;  %s1661_s4 = scalar_lea.vmem %s1660_s30, 256 }
 0x18a   : > { %v1228_v41 = vsel %vm1227_vm14, %v1224_v17, %v1226_v16  ;;  %v1229_v42 = vsel %vm1227_vm14, %v1226_v16, %v1224_v17  ;;  %v1209_v16 = vld [vmem:[#allocation3 + $0xb0] sm:$0xf]  ;;  %v1275_v17 = vld [vmem:[#allocation3 + $0xbc] sm:$0xf]  ;;  %p1663_p13 = scmp.lt.s32.totalorder %s1661_s4, %s1655_s9 }
 0x18b   : > { %v1234_v63 = vcombine.low %v1228_v41, %v1229_v42  ;;  %v1221_v34 = vmul.f32 %v1219_v11, %v1209_v16 }
 0x18c   : > { %p1664_p3 = por %p1663_p13, %p1662_p10 }
 0x18d   : > { %v1248_v38 = vpop.permute.xlu1 %1247  ;;  %v1246_v39 = vpop.permute.xlu0 %1245  ;;  %v1241_v22 = vrot.slane %v1234_v63, %v2035_v55  ;;  %v1222_v41 = vadd.f32 %v1221_v34, %v1134_v29  ;;  %v1341_v63 = vstv %s1340_s19 }
 0x18e   : > { %v1250_v43 = vsel %vm1249_vm15, %v1246_v39, %v1248_v38  ;;  %v1251_v45 = vsel %vm1249_vm15, %v1248_v38, %v1246_v39  ;;  %p1665_p7 = pnand %p1664_p3, %p1658_p8 }
 0x18f   : > { %v1256_v52 = vcombine.low %v1250_v43, %v1251_v45  ;;  %v1243_v28 = vmul.f32 %v1241_v22, %v1231_v1 }
 0x191   : > { %v1263_v0 = vrot.slane %v1256_v52, %v2035_v55  ;;  %v1270_v48 = vpop.permute.xlu1 %1269  ;;  %v1268_v2 = vpop.permute.xlu0 %1267  ;;  %v1244_v45 = vadd.f32 %v1243_v28, %v1156_v40 }
 0x192   : > { %v1272_v7 = vsel %vm1271_vm0, %v1268_v2, %v1270_v48  ;;  %v1273_v8 = vsel %vm1271_vm0, %v1270_v48, %v1268_v2 }
 0x193   : > { %v1278_v12 = vcombine.low %v1272_v7, %v1273_v8  ;;  %v1265_v23 = vmul.f32 %v1263_v0, %v1253_v6 }
 0x195   : > { %v1285_v24 = vrot.slane %v1278_v12, %v2035_v55  ;;  %v1292_v25 = vpop.permute.xlu1 %1291  ;;  %v1290_v26 = vpop.permute.xlu0 %1289  ;;  %v1266_v31 = vadd.f32 %v1265_v23, %v1178_v56 }
 0x196   : > { %v1294_v30 = vsel %vm1293_vm1, %v1290_v26, %v1292_v25  ;;  %v1295_v19 = vsel %vm1293_vm1, %v1292_v25, %v1290_v26 }
 0x197   : > { %v1287_v35 = vmul.f32 %v1285_v24, %v1275_v17  ;;  %v1300_v36 = vcombine.low %v1294_v30, %v1295_v19 }
 0x199   : > { %v1288_v38 = vadd.f32 %v1287_v35, %v1200_v32  ;;  %v1307_v39 = vrot.slane %v1300_v36, %v2035_v55 }
 0x19b   : > { %v1312_v42 = vadd.f32 %v1288_v38, %v1266_v31  ;;  %v1309_v43 = vmul.f32 %v1307_v39, %v1297_v37 }
 0x19d   : > { %v1310_v33 = vadd.f32 %v1309_v43, %v1222_v41 }
 0x19f   : > { %v1311_v46 = vadd.f32 %v1310_v33, %v1244_v45 }
 0x1a1   : > { %v1313_v47 = vadd.f32 %v1312_v42, %v1311_v46 }
 0x1a3   : > { %v1321_v49 = vrot.slane %v1313_v47, %v2035_v55 }
 0x1a5   : > { %v1322_v50 = vcombine.high %v1321_v49, %v1321_v49  ;;  %v1326_v20 = vsel %vm1325_vm2, %v1321_v49, 0.0 }
 0x1a6   : > { %v1327_v52 = vrot.slane %v1326_v20, 4 }
 0x1a7   : > { %v1333_v53 = vsel %vm1325_vm2, %v1322_v50, 0.0 }
 0x1a8   : > { %v1328_v54 = vadd.f32 %v1327_v52, %v1326_v20  ;;  %v1334_v57 = vrot.slane %v1333_v53, 4 }
 0x1aa   : > { %v1329_v58 = vrot.slane %v1328_v54, 2  ;;  %v1335_v59 = vadd.f32 %v1334_v57, %v1333_v53 }
 0x1ac   : > { %v1330_v44 = vadd.f32 %v1329_v58, %v1328_v54  ;;  %v1336_v60 = vrot.slane %v1335_v59, 2 }
 0x1ae   : > { %v1331_v61 = vrot.slane %v1330_v44, 1  ;;  %v1337_v62 = vadd.f32 %v1336_v60, %v1335_v59 }
 0x1b0   : > { %v1332_v0 = vadd.f32 %v1331_v61, %v1330_v44  ;;  %v1338_v48 = vrot.slane %v1337_v62, 1 }
 0x1b2   : > { %v1339_v2 = vadd.f32 %v1338_v48, %v1337_v62  ;;  %v1342_v55 = vadd.f32 %v1341_v63, %v1332_v0 }
 0x1b4   : > { %v1343_v3 = vadd.f32 %v1341_v63, %v1339_v2  ;;  %v1470_v4 = vmul.f32 -1.442695, %v1342_v55 }
 0x1b6   : > { %1588 = vpow2.f32 %v1470_v4  ;;  %v1471_v6 = vmul.f32 -1.442695, %v1343_v3 }
 0x1b8   : > { %1590 = vpow2.f32 %v1471_v6 }
 0x1c0   : > { %v1589_v7 = vpop.eup %1588 }
 0x1c1   : > { %v1350_v8 = vadd.f32 1.0, %v1589_v7 }
 0x1c2   : > { %v1591_v5 = vpop.eup %1590 }
 0x1c3   : > { %v1351_v9 = vadd.f32 1.0, %v1591_v5  ;;  %1592 = vrcp.f32 %v1350_v8 }
 0x1c5   : > { %1594 = vrcp.f32 %v1351_v9 }
 0x1cd   : > { %v1593_v10 = vpop.eup %1592 }
 0x1cf   : > { %v1595_v11 = vpop.eup %1594 }
 0x1d0   : > { %v1358_v12 = vcombine.low %v1593_v10, %v1595_v11 }
 0x1d2   : > { %v1360_v14 = vmul.f32 %v1596_v13, %v1358_v12 }
 0x1d4   : > { %1361 = vst [vmem:[%s202_s26] sm:$0xff] %v1360_v14 }
 0x1d5   : > { %1668 = shalt.err (!%p1665_p7)
}
 0x1d6   : > { %s1669_s24 = scalar_lea.hbm %s2273_s7, 128  ;;  %s1673_s12 = scalar_lea.hbm %s2320_s3, 256 }
 0x1d7   : > { %p1670_p9 = scmp.ne.s32.totalorder %s2273_s7, %s1669_s24  ;;  %p1674_p0 = scmp.lt.u32.totalorder %s2273_s7, %s2320_s3 }
 0x1d8   : > { %p1675_p1 = scmp.lt.u32.totalorder %s1673_s12, %s1669_s24  ;;  %p1677_p4 = scmp.lt.u32.totalorder %s1669_s24, %s2273_s7 }
 0x1d9   : > { %p1671_p2 = pnand %p1670_p9, %p1895_p12 }
 0x1da   : > { %p1676_p11 = por %p1675_p1, %p1674_p0 }
 0x1db   : > { %p1672_p5 = pneg %p1671_p2 }
 0x1dc   : > { %p1678_p6 = por %p1677_p4, %p1676_p11 }
 0x1de   : > { %p1679_p8 = pnand %p1678_p6, %p1672_p5 }
 0x1e0   : > { %1682 = shalt.err (!%p1679_p8)
}
 0x1e1   : > { %1485 = dma.vmem_to_hbm [thread:$0]  (%p1895_p12), %s2275_s27, 128, %s2273_s7, %s1363_s8  }
 0x1e2 PF: > { %s1389_s29 = sand.u32 1, %s1713_s14   ;;  %p2335_p10 = scmp.ne.s32.totalorder %s2325_s20, 0 }
 0x1e3   : > { %p2336_p13 = scmp.ge.s32.totalorder %s1725_s17, 2  ;;  %s1390_s23 = scalar_lea.sflag [#allocation5], %s1389_s29 }
 0x1e5   : > { %p1496_p3 = pnand %p2336_p13, %p2335_p10 }
 0x1e7   : > { %1708 = dma.done.wait (!%p1496_p3), %s1390_s23, 128  }
 0x1e8   : > { %1710 = vsyncadd (!%p1496_p3), %s1390_s23, 4294967168  ;;  %p18_p7 = scmp.ge.s32.totalorder %s1860_s25, 4   ;;  %s2337_s14 = smov %s1717_s15 }
 0x1e9   : > { %s2338_s15 = smov %s1721_s16  ;;  %s2339_s16 = smov %s1891_s13 }
 0x1ea   : > { %s2340_s17 = smov %s1860_s25  ;;  %20 = sbr.rel (!%p18_p7) target bundleno = 8 (0x8), region = 130 }
 0x1f1   :  { %1395 = vsyncpa [#allocation4], 1 }
 0x1f2   :  { %1397 = vsyncpa [#allocation4 + $0x1], 1 }
 0x1f3   :  { %1398 = vsyncpa [#allocation7], 1 }
 0x1f4   :  { %1400 = vsyncpa [#allocation7 + $0x1], 1 }
 0x1f5   :  { %1401 = vsyncpa [#allocation5], 1 }
 0x1f6   :  { %1403 = vsyncpa [#allocation5 + $0x1], 1 }

</bundles_post_ra>
